<compile_context>
chip_gen: v7x
topology: tpu7x:2x2x1
jax: 0.10.0
libtpu: 0.0.40
codegen_flags: <defaults>
</compile_context>

<pallas_src>
import functools

import jax
import jax.numpy as jnp
from jax.experimental import pallas as pl
from jax.experimental.pallas import tpu as pltpu


# ---------------------------------------------------------------------------
# Pallas kernel: lane-dense transposed GEMM with fused LeakyReLU / batch mean.
# ---------------------------------------------------------------------------
def _gemm_t_kernel(w_ref, a_ref, o_ref, acc_ref, *, negative_slope, apply_act,
                   fuse_mean):
    k = pl.program_id(1)

    @pl.when(k == 0)
    def _():
        acc_ref[...] = jnp.zeros_like(acc_ref)

    acc_ref[...] += jnp.dot(w_ref[...], a_ref[...],
                            preferred_element_type=jnp.float32)

    @pl.when(k == pl.num_programs(1) - 1)
    def _():
        acc = acc_ref[...]
        if apply_act:
            acc = jnp.where(acc >= 0.0, acc, negative_slope * acc)
        if fuse_mean:
            # Lane axis of acc is the flattened batch (final conv is 1x1 spatial).
            o_ref[...] = jnp.mean(acc, axis=1, keepdims=True).astype(o_ref.dtype)
        else:
            o_ref[...] = acc.astype(o_ref.dtype)


def _largest_aligned_divisor(dim, cap, align=128):
    best = 0
    d = align
    while d <= min(dim, cap):
        if dim % d == 0:
            best = d
        d += align
    return best


def _choose_m_tile(m, cap=2048):
    # Whole (full-extent) block when small / not 128-aligned; otherwise the
    # largest 128-aligned exact divisor leaving >=2 blocks (v7x has 2 TCs).
    if m <= 256 or m % 128 != 0:
        return m
    t = _largest_aligned_divisor(m, min(cap, m // 2))
    return t if t else m


def _choose_k_tile(k, cap=2048):
    if k <= cap or k % 128 != 0:
        return k
    t = _largest_aligned_divisor(k, cap)
    return t if t else k


def gemm_t(w_r, a_t, *, apply_act, fuse_mean=False, negative_slope=0.2,
           out_dtype=jnp.bfloat16):
    """O^T = w_r @ a_t with w_r:(Cout,K), a_t:(K,M); fused LeakyReLU / mean."""
    cout, kdim = w_r.shape
    kdim2, m = a_t.shape
    assert kdim == kdim2
    tm = _choose_m_tile(m)
    tk = _choose_k_tile(kdim)
    gm, gk = m // tm, kdim // tk
    assert gm * tm == m and gk * tk == kdim  # exact tiling, no padding copies

    if fuse_mean:
        assert gm == 1, "fused batch-mean expects a single M block"
        out_shape = jax.ShapeDtypeStruct((1, 1), jnp.float32)
        out_spec = pl.BlockSpec((1, 1), lambda i, k: (0, 0))
    else:
        out_shape = jax.ShapeDtypeStruct((cout, m), out_dtype)
        out_spec = pl.BlockSpec((cout, tm), lambda i, k: (0, i))

    kern = functools.partial(_gemm_t_kernel, negative_slope=negative_slope,
                             apply_act=apply_act, fuse_mean=fuse_mean)
    return pl.pallas_call(
        kern,
        out_shape=out_shape,
        grid_spec=pltpu.PrefetchScalarGridSpec(
            num_scalar_prefetch=0,
            grid=(gm, gk),
            in_specs=[pl.BlockSpec((cout, tk), lambda i, k: (0, k)),
                      pl.BlockSpec((tk, tm), lambda i, k: (k, i))],
            out_specs=out_spec,
            scratch_shapes=[pltpu.VMEM((cout, tm), jnp.float32)]),
        compiler_params=pltpu.CompilerParams(
            dimension_semantics=("parallel", "arbitrary"),
            vmem_limit_bytes=32 * 1024 * 1024),
    )(w_r, a_t)


# ---------------------------------------------------------------------------
# Conv layer wrapper: channel-major activations, transpose-free patch build.
# ---------------------------------------------------------------------------
def conv_layer(h, w, stride, pad, *, apply_act, fuse_mean=False):
    # h: (Cin, N, H, W) bf16 channel-major; w: (Cout, Cin, kh, kw) f32 (PyTorch).
    cout, cin, kh, kw = w.shape
    c, n, hh, ww = h.shape
    assert c == cin
    if pad:
        h = jnp.pad(h, ((0, 0), (0, 0), (pad, pad), (pad, pad)))
    hp, wp = hh + 2 * pad, ww + 2 * pad
    ho = (hp - kh) // stride + 1
    wo = (wp - kw) // stride + 1

    # A^T: (kh*kw*Cin, N*Ho*Wo) built by stacking tap slices (no transposes).
    taps = []
    for i in range(kh):
        for j in range(kw):
            taps.append(h[:, :, i:i + stride * ho:stride, j:j + stride * wo:stride])
    a_t = jnp.stack(taps, axis=0).reshape(kh * kw * cin, n * ho * wo)

    # Weight folded to (Cout, K) with K order (tap, Cin) to match A^T.
    w_r = jnp.transpose(w, (0, 2, 3, 1)).reshape(cout, kh * kw * cin)
    w_r = w_r.astype(jnp.bfloat16)

    if fuse_mean:
        assert ho == 1 and wo == 1, "final conv must reduce to 1x1 spatial"
        return gemm_t(w_r, a_t, apply_act=apply_act, fuse_mean=True)  # (1, 1) f32

    o = gemm_t(w_r, a_t, apply_act=apply_act)          # (Cout, N*Ho*Wo) bf16
    return o.reshape(cout, n, ho, wo)                  # free reshape, stays CNHW


# ---------------------------------------------------------------------------
# Model
# ---------------------------------------------------------------------------
def init_params(key, nc, ndf):
    # Conv weights of the Sequential (all bias=False), DCGAN-style N(0, 0.02).
    shapes = [
        (ndf, nc, 4, 4),
        (ndf * 2, ndf, 4, 4),
        (ndf * 4, ndf * 2, 4, 4),
        (ndf * 8, ndf * 4, 4, 4),
        (1, ndf * 8, 6, 6),
    ]
    keys = jax.random.split(key, len(shapes))
    return [0.02 * jax.random.normal(k, s, dtype=jnp.float32)
            for k, s in zip(keys, shapes)]


def dcgan_d_nobn_forward(params, x):
    # x: (N, C, H, W) float32 (PyTorch layout). Single entry transpose to
    # channel-major + bf16; afterwards no layout copies between layers.
    h = jnp.transpose(x, (1, 0, 2, 3)).astype(jnp.bfloat16)   # (C, N, H, W)
    layer_cfg = [(2, 1), (2, 1), (2, 1), (2, 1), (1, 0)]      # (stride, pad)
    for idx, (w, (s, p)) in enumerate(zip(params, layer_cfg)):
        if idx == len(params) - 1:
            out = conv_layer(h, w, s, p, apply_act=False, fuse_mean=True)
            return out.reshape(1)      # == output.mean(0).view(1)
        h = conv_layer(h, w, s, p, apply_act=True)            # fused LeakyReLU(0.2)
    raise AssertionError("unreachable")


if __name__ == "__main__":
    # Input spatial size must be 96: four stride-2 (k=4, p=1) convs halve it to
    # 6x6, which the final 6x6 valid conv reduces to 1x1 (required by .view(1)).
    nc, ndf, batch, spatial = 3, 8, 2, 96
    key = jax.random.PRNGKey(0)
    kx, kp = jax.random.split(key)
    x = jax.random.normal(kx, (batch, nc, spatial, spatial), dtype=jnp.float32)
    params = init_params(kp, nc, ndf)

    out = jax.jit(dcgan_d_nobn_forward)(params, x)
    jax.block_until_ready(out)
    assert out.shape == (1,) and out.dtype == jnp.float32
    print("KERNEL_OK")
</pallas_src>

<mosaic_0001>
module attributes {stable_mosaic.version = 11 : i64} {
  func.func @_gemm_t_kernel(%arg0: i32, %arg1: i32, %arg2: memref<8x48xbf16, #tpu.memory_space<vmem>>, %arg3: memref<48x1536xbf16, #tpu.memory_space<vmem>>, %arg4: memref<8x1536xbf16, #tpu.memory_space<vmem>>, %arg5: memref<8x1536xf32, #tpu.memory_space<vmem>>) attributes {dimension_semantics = [#tpu.dimension_semantics<parallel>, #tpu.dimension_semantics<arbitrary>], iteration_bounds = array<i64: 3, 1>, scalar_prefetch = 0 : i64, scratch_operands = 1 : i64, tpu.core_type = #tpu.core_type<tc>, window_params = [{transform_indices = @transform_0, window_bounds = array<i64: 8, 48>}, {transform_indices = @transform_1, window_bounds = array<i64: 48, 1536>}, {transform_indices = @transform_2, window_bounds = array<i64: 8, 1536>}]} {
    %c0_i32 = arith.constant 0 : i32
    %0 = arith.cmpi eq, %arg1, %c0_i32 : i32
    %1 = arith.extui %0 : i1 to i32
    %c0_i32_0 = arith.constant 0 : i32
    %2 = arith.cmpi ne, %1, %c0_i32_0 : i32
    scf.if %2 {
      %cst_10 = arith.constant 0.000000e+00 : f32
      %12 = vector.broadcast %cst_10 : f32 to vector<8x1536xf32>
      %c0_11 = arith.constant 0 : index
      %c0_12 = arith.constant 0 : index
      %13 = vector.load %arg5[%c0_11, %c0_12] : memref<8x1536xf32, #tpu.memory_space<vmem>>, vector<8x1536xf32>
      tpu.vector_store %arg5[%c0_11, %c0_12], %12 {strides = array<i32>} : memref<8x1536xf32, #tpu.memory_space<vmem>>, vector<8x1536xf32>,
    } else {
    }
    %c0 = arith.constant 0 : index
    %c0_1 = arith.constant 0 : index
    %3 = vector.load %arg5[%c0, %c0_1] : memref<8x1536xf32, #tpu.memory_space<vmem>>, vector<8x1536xf32>
    %c0_2 = arith.constant 0 : index
    %c0_3 = arith.constant 0 : index
    %4 = vector.load %arg2[%c0_2, %c0_3] : memref<8x48xbf16, #tpu.memory_space<vmem>>, vector<8x48xbf16>
    %c0_4 = arith.constant 0 : index
    %c0_5 = arith.constant 0 : index
    %5 = vector.load %arg3[%c0_4, %c0_5] : memref<48x1536xbf16, #tpu.memory_space<vmem>>, vector<48x1536xbf16>
    %cst = arith.constant dense<0.000000e+00> : vector<8x1536xf32>
    %6 = tpu.matmul %4, %5, %cst {dimension_numbers = #tpu.dot_dimension_numbers<[1], [0], [0], [1], [0, 0, 1, 1], [], []>} : vector<8x48xbf16>, vector<48x1536xbf16>, vector<8x1536xf32> -> vector<8x1536xf32>
    %7 = arith.addf %3, %6 : vector<8x1536xf32>
    %c0_6 = arith.constant 0 : index
    %c0_7 = arith.constant 0 : index
    %8 = vector.load %arg5[%c0_6, %c0_7] : memref<8x1536xf32, #tpu.memory_space<vmem>>, vector<8x1536xf32>
    tpu.vector_store %arg5[%c0_6, %c0_7], %7 {strides = array<i32>} : memref<8x1536xf32, #tpu.memory_space<vmem>>, vector<8x1536xf32>,
    %c0_i32_8 = arith.constant 0 : i32
    %9 = arith.cmpi eq, %arg1, %c0_i32_8 : i32
    %10 = arith.extui %9 : i1 to i32
    %c0_i32_9 = arith.constant 0 : i32
    %11 = arith.cmpi ne, %10, %c0_i32_9 : i32
    scf.if %11 {
      %c0_10 = arith.constant 0 : index
      %c0_11 = arith.constant 0 : index
      %12 = vector.load %arg5[%c0_10, %c0_11] : memref<8x1536xf32, #tpu.memory_space<vmem>>, vector<8x1536xf32>
      %cst_12 = arith.constant 0.000000e+00 : f32
      %13 = vector.broadcast %cst_12 : f32 to vector<8x1536xf32>
      %14 = arith.cmpf oge, %12, %13 : vector<8x1536xf32>
      %cst_13 = arith.constant 2.000000e-01 : f32
      %15 = vector.broadcast %cst_13 : f32 to vector<8x1536xf32>
      %16 = arith.mulf %15, %12 : vector<8x1536xf32>
      %17 = arith.select %14, %12, %16 : vector<8x1536xi1>, vector<8x1536xf32>
      %18 = arith.truncf %17 : vector<8x1536xf32> to vector<8x1536xbf16>
      %c0_14 = arith.constant 0 : index
      %c0_15 = arith.constant 0 : index
      %19 = vector.load %arg4[%c0_14, %c0_15] : memref<8x1536xbf16, #tpu.memory_space<vmem>>, vector<8x1536xbf16>
      tpu.vector_store %arg4[%c0_14, %c0_15], %18 {strides = array<i32>} : memref<8x1536xbf16, #tpu.memory_space<vmem>>, vector<8x1536xbf16>,
    } else {
    }
    return
  }
  func.func @transform_0(%arg0: i32, %arg1: i32) -> (i32, i32) {
    %c0_i32 = arith.constant 0 : i32
    %c0_i32_0 = arith.constant 0 : i32
    return %c0_i32, %arg1 : i32, i32
  }
  func.func @transform_1(%arg0: i32, %arg1: i32) -> (i32, i32) {
    %c0_i32 = arith.constant 0 : i32
    return %arg1, %arg0 : i32, i32
  }
  func.func @transform_2(%arg0: i32, %arg1: i32) -> (i32, i32) {
    %c0_i32 = arith.constant 0 : i32
    %c0_i32_0 = arith.constant 0 : i32
    return %c0_i32, %arg0 : i32, i32
  }
}

module attributes {stable_mosaic.version = 11 : i64} {
  func.func @_gemm_t_kernel(%arg0: i32, %arg1: i32, %arg2: memref<16x128xbf16, #tpu.memory_space<vmem>>, %arg3: memref<128x384xbf16, #tpu.memory_space<vmem>>, %arg4: memref<16x384xbf16, #tpu.memory_space<vmem>>, %arg5: memref<16x384xf32, #tpu.memory_space<vmem>>) attributes {dimension_semantics = [#tpu.dimension_semantics<parallel>, #tpu.dimension_semantics<arbitrary>], iteration_bounds = array<i64: 3, 1>, scalar_prefetch = 0 : i64, scratch_operands = 1 : i64, tpu.core_type = #tpu.core_type<tc>, window_params = [{transform_indices = @transform_0, window_bounds = array<i64: 16, 128>}, {transform_indices = @transform_1, window_bounds = array<i64: 128, 384>}, {transform_indices = @transform_2, window_bounds = array<i64: 16, 384>}]} {
    %c0_i32 = arith.constant 0 : i32
    %0 = arith.cmpi eq, %arg1, %c0_i32 : i32
    %1 = arith.extui %0 : i1 to i32
    %c0_i32_0 = arith.constant 0 : i32
    %2 = arith.cmpi ne, %1, %c0_i32_0 : i32
    scf.if %2 {
      %cst_10 = arith.constant 0.000000e+00 : f32
      %12 = vector.broadcast %cst_10 : f32 to vector<16x384xf32>
      %c0_11 = arith.constant 0 : index
      %c0_12 = arith.constant 0 : index
      %13 = vector.load %arg5[%c0_11, %c0_12] : memref<16x384xf32, #tpu.memory_space<vmem>>, vector<16x384xf32>
      tpu.vector_store %arg5[%c0_11, %c0_12], %12 {strides = array<i32>} : memref<16x384xf32, #tpu.memory_space<vmem>>, vector<16x384xf32>,
    } else {
    }
    %c0 = arith.constant 0 : index
    %c0_1 = arith.constant 0 : index
    %3 = vector.load %arg5[%c0, %c0_1] : memref<16x384xf32, #tpu.memory_space<vmem>>, vector<16x384xf32>
    %c0_2 = arith.constant 0 : index
    %c0_3 = arith.constant 0 : index
    %4 = vector.load %arg2[%c0_2, %c0_3] : memref<16x128xbf16, #tpu.memory_space<vmem>>, vector<16x128xbf16>
    %c0_4 = arith.constant 0 : index
    %c0_5 = arith.constant 0 : index
    %5 = vector.load %arg3[%c0_4, %c0_5] : memref<128x384xbf16, #tpu.memory_space<vmem>>, vector<128x384xbf16>
    %cst = arith.constant dense<0.000000e+00> : vector<16x384xf32>
    %6 = tpu.matmul %4, %5, %cst {dimension_numbers = #tpu.dot_dimension_numbers<[1], [0], [0], [1], [0, 0, 1, 1], [], []>} : vector<16x128xbf16>, vector<128x384xbf16>, vector<16x384xf32> -> vector<16x384xf32>
    %7 = arith.addf %3, %6 : vector<16x384xf32>
    %c0_6 = arith.constant 0 : index
    %c0_7 = arith.constant 0 : index
    %8 = vector.load %arg5[%c0_6, %c0_7] : memref<16x384xf32, #tpu.memory_space<vmem>>, vector<16x384xf32>
    tpu.vector_store %arg5[%c0_6, %c0_7], %7 {strides = array<i32>} : memref<16x384xf32, #tpu.memory_space<vmem>>, vector<16x384xf32>,
    %c0_i32_8 = arith.constant 0 : i32
    %9 = arith.cmpi eq, %arg1, %c0_i32_8 : i32
    %10 = arith.extui %9 : i1 to i32
    %c0_i32_9 = arith.constant 0 : i32
    %11 = arith.cmpi ne, %10, %c0_i32_9 : i32
    scf.if %11 {
      %c0_10 = arith.constant 0 : index
      %c0_11 = arith.constant 0 : index
      %12 = vector.load %arg5[%c0_10, %c0_11] : memref<16x384xf32, #tpu.memory_space<vmem>>, vector<16x384xf32>
      %cst_12 = arith.constant 0.000000e+00 : f32
      %13 = vector.broadcast %cst_12 : f32 to vector<16x384xf32>
      %14 = arith.cmpf oge, %12, %13 : vector<16x384xf32>
      %cst_13 = arith.constant 2.000000e-01 : f32
      %15 = vector.broadcast %cst_13 : f32 to vector<16x384xf32>
      %16 = arith.mulf %15, %12 : vector<16x384xf32>
      %17 = arith.select %14, %12, %16 : vector<16x384xi1>, vector<16x384xf32>
      %18 = arith.truncf %17 : vector<16x384xf32> to vector<16x384xbf16>
      %c0_14 = arith.constant 0 : index
      %c0_15 = arith.constant 0 : index
      %19 = vector.load %arg4[%c0_14, %c0_15] : memref<16x384xbf16, #tpu.memory_space<vmem>>, vector<16x384xbf16>
      tpu.vector_store %arg4[%c0_14, %c0_15], %18 {strides = array<i32>} : memref<16x384xbf16, #tpu.memory_space<vmem>>, vector<16x384xbf16>,
    } else {
    }
    return
  }
  func.func @transform_0(%arg0: i32, %arg1: i32) -> (i32, i32) {
    %c0_i32 = arith.constant 0 : i32
    %c0_i32_0 = arith.constant 0 : i32
    return %c0_i32, %arg1 : i32, i32
  }
  func.func @transform_1(%arg0: i32, %arg1: i32) -> (i32, i32) {
    %c0_i32 = arith.constant 0 : i32
    return %arg1, %arg0 : i32, i32
  }
  func.func @transform_2(%arg0: i32, %arg1: i32) -> (i32, i32) {
    %c0_i32 = arith.constant 0 : i32
    %c0_i32_0 = arith.constant 0 : i32
    return %c0_i32, %arg0 : i32, i32
  }
}

module attributes {stable_mosaic.version = 11 : i64} {
  func.func @_gemm_t_kernel(%arg0: i32, %arg1: i32, %arg2: memref<32x256xbf16, #tpu.memory_space<vmem>>, %arg3: memref<256x288xbf16, #tpu.memory_space<vmem>>, %arg4: memref<32x288xbf16, #tpu.memory_space<vmem>>, %arg5: memref<32x288xf32, #tpu.memory_space<vmem>>) attributes {dimension_semantics = [#tpu.dimension_semantics<parallel>, #tpu.dimension_semantics<arbitrary>], iteration_bounds = array<i64: 1, 1>, scalar_prefetch = 0 : i64, scratch_operands = 1 : i64, tpu.core_type = #tpu.core_type<tc>, window_params = [{transform_indices = @transform_0, window_bounds = array<i64: 32, 256>}, {transform_indices = @transform_1, window_bounds = array<i64: 256, 288>}, {transform_indices = @transform_2, window_bounds = array<i64: 32, 288>}]} {
    %c0_i32 = arith.constant 0 : i32
    %0 = arith.cmpi eq, %arg1, %c0_i32 : i32
    %1 = arith.extui %0 : i1 to i32
    %c0_i32_0 = arith.constant 0 : i32
    %2 = arith.cmpi ne, %1, %c0_i32_0 : i32
    scf.if %2 {
      %cst_10 = arith.constant 0.000000e+00 : f32
      %12 = vector.broadcast %cst_10 : f32 to vector<32x288xf32>
      %c0_11 = arith.constant 0 : index
      %c0_12 = arith.constant 0 : index
      %13 = vector.load %arg5[%c0_11, %c0_12] : memref<32x288xf32, #tpu.memory_space<vmem>>, vector<32x288xf32>
      tpu.vector_store %arg5[%c0_11, %c0_12], %12 {strides = array<i32>} : memref<32x288xf32, #tpu.memory_space<vmem>>, vector<32x288xf32>,
    } else {
    }
    %c0 = arith.constant 0 : index
    %c0_1 = arith.constant 0 : index
    %3 = vector.load %arg5[%c0, %c0_1] : memref<32x288xf32, #tpu.memory_space<vmem>>, vector<32x288xf32>
    %c0_2 = arith.constant 0 : index
    %c0_3 = arith.constant 0 : index
    %4 = vector.load %arg2[%c0_2, %c0_3] : memref<32x256xbf16, #tpu.memory_space<vmem>>, vector<32x256xbf16>
    %c0_4 = arith.constant 0 : index
    %c0_5 = arith.constant 0 : index
    %5 = vector.load %arg3[%c0_4, %c0_5] : memref<256x288xbf16, #tpu.memory_space<vmem>>, vector<256x288xbf16>
    %cst = arith.constant dense<0.000000e+00> : vector<32x288xf32>
    %6 = tpu.matmul %4, %5, %cst {dimension_numbers = #tpu.dot_dimension_numbers<[1], [0], [0], [1], [0, 0, 1, 1], [], []>} : vector<32x256xbf16>, vector<256x288xbf16>, vector<32x288xf32> -> vector<32x288xf32>
    %7 = arith.addf %3, %6 : vector<32x288xf32>
    %c0_6 = arith.constant 0 : index
    %c0_7 = arith.constant 0 : index
    %8 = vector.load %arg5[%c0_6, %c0_7] : memref<32x288xf32, #tpu.memory_space<vmem>>, vector<32x288xf32>
    tpu.vector_store %arg5[%c0_6, %c0_7], %7 {strides = array<i32>} : memref<32x288xf32, #tpu.memory_space<vmem>>, vector<32x288xf32>,
    %c0_i32_8 = arith.constant 0 : i32
    %9 = arith.cmpi eq, %arg1, %c0_i32_8 : i32
    %10 = arith.extui %9 : i1 to i32
    %c0_i32_9 = arith.constant 0 : i32
    %11 = arith.cmpi ne, %10, %c0_i32_9 : i32
    scf.if %11 {
      %c0_10 = arith.constant 0 : index
      %c0_11 = arith.constant 0 : index
      %12 = vector.load %arg5[%c0_10, %c0_11] : memref<32x288xf32, #tpu.memory_space<vmem>>, vector<32x288xf32>
      %cst_12 = arith.constant 0.000000e+00 : f32
      %13 = vector.broadcast %cst_12 : f32 to vector<32x288xf32>
      %14 = arith.cmpf oge, %12, %13 : vector<32x288xf32>
      %cst_13 = arith.constant 2.000000e-01 : f32
      %15 = vector.broadcast %cst_13 : f32 to vector<32x288xf32>
      %16 = arith.mulf %15, %12 : vector<32x288xf32>
      %17 = arith.select %14, %12, %16 : vector<32x288xi1>, vector<32x288xf32>
      %18 = arith.truncf %17 : vector<32x288xf32> to vector<32x288xbf16>
      %c0_14 = arith.constant 0 : index
      %c0_15 = arith.constant 0 : index
      %19 = vector.load %arg4[%c0_14, %c0_15] : memref<32x288xbf16, #tpu.memory_space<vmem>>, vector<32x288xbf16>
      tpu.vector_store %arg4[%c0_14, %c0_15], %18 {strides = array<i32>} : memref<32x288xbf16, #tpu.memory_space<vmem>>, vector<32x288xbf16>,
    } else {
    }
    return
  }
  func.func @transform_0(%arg0: i32, %arg1: i32) -> (i32, i32) {
    %c0_i32 = arith.constant 0 : i32
    %c0_i32_0 = arith.constant 0 : i32
    return %c0_i32, %arg1 : i32, i32
  }
  func.func @transform_1(%arg0: i32, %arg1: i32) -> (i32, i32) {
    %c0_i32 = arith.constant 0 : i32
    return %arg1, %arg0 : i32, i32
  }
  func.func @transform_2(%arg0: i32, %arg1: i32) -> (i32, i32) {
    %c0_i32 = arith.constant 0 : i32
    %c0_i32_0 = arith.constant 0 : i32
    return %c0_i32, %arg0 : i32, i32
  }
}

module attributes {stable_mosaic.version = 11 : i64} {
  func.func @_gemm_t_kernel(%arg0: i32, %arg1: i32, %arg2: memref<64x512xbf16, #tpu.memory_space<vmem>>, %arg3: memref<512x72xbf16, #tpu.memory_space<vmem>>, %arg4: memref<64x72xbf16, #tpu.memory_space<vmem>>, %arg5: memref<64x72xf32, #tpu.memory_space<vmem>>) attributes {dimension_semantics = [#tpu.dimension_semantics<parallel>, #tpu.dimension_semantics<arbitrary>], iteration_bounds = array<i64: 1, 1>, scalar_prefetch = 0 : i64, scratch_operands = 1 : i64, tpu.core_type = #tpu.core_type<tc>, window_params = [{transform_indices = @transform_0, window_bounds = array<i64: 64, 512>}, {transform_indices = @transform_1, window_bounds = array<i64: 512, 72>}, {transform_indices = @transform_2, window_bounds = array<i64: 64, 72>}]} {
    %c0_i32 = arith.constant 0 : i32
    %0 = arith.cmpi eq, %arg1, %c0_i32 : i32
    %1 = arith.extui %0 : i1 to i32
    %c0_i32_0 = arith.constant 0 : i32
    %2 = arith.cmpi ne, %1, %c0_i32_0 : i32
    scf.if %2 {
      %cst_10 = arith.constant 0.000000e+00 : f32
      %12 = vector.broadcast %cst_10 : f32 to vector<64x72xf32>
      %c0_11 = arith.constant 0 : index
      %c0_12 = arith.constant 0 : index
      %13 = vector.load %arg5[%c0_11, %c0_12] : memref<64x72xf32, #tpu.memory_space<vmem>>, vector<64x72xf32>
      tpu.vector_store %arg5[%c0_11, %c0_12], %12 {strides = array<i32>} : memref<64x72xf32, #tpu.memory_space<vmem>>, vector<64x72xf32>,
    } else {
    }
    %c0 = arith.constant 0 : index
    %c0_1 = arith.constant 0 : index
    %3 = vector.load %arg5[%c0, %c0_1] : memref<64x72xf32, #tpu.memory_space<vmem>>, vector<64x72xf32>
    %c0_2 = arith.constant 0 : index
    %c0_3 = arith.constant 0 : index
    %4 = vector.load %arg2[%c0_2, %c0_3] : memref<64x512xbf16, #tpu.memory_space<vmem>>, vector<64x512xbf16>
    %c0_4 = arith.constant 0 : index
    %c0_5 = arith.constant 0 : index
    %5 = vector.load %arg3[%c0_4, %c0_5] : memref<512x72xbf16, #tpu.memory_space<vmem>>, vector<512x72xbf16>
    %cst = arith.constant dense<0.000000e+00> : vector<64x72xf32>
    %6 = tpu.matmul %4, %5, %cst {dimension_numbers = #tpu.dot_dimension_numbers<[1], [0], [0], [1], [0, 0, 1, 1], [], []>} : vector<64x512xbf16>, vector<512x72xbf16>, vector<64x72xf32> -> vector<64x72xf32>
    %7 = arith.addf %3, %6 : vector<64x72xf32>
    %c0_6 = arith.constant 0 : index
    %c0_7 = arith.constant 0 : index
    %8 = vector.load %arg5[%c0_6, %c0_7] : memref<64x72xf32, #tpu.memory_space<vmem>>, vector<64x72xf32>
    tpu.vector_store %arg5[%c0_6, %c0_7], %7 {strides = array<i32>} : memref<64x72xf32, #tpu.memory_space<vmem>>, vector<64x72xf32>,
    %c0_i32_8 = arith.constant 0 : i32
    %9 = arith.cmpi eq, %arg1, %c0_i32_8 : i32
    %10 = arith.extui %9 : i1 to i32
    %c0_i32_9 = arith.constant 0 : i32
    %11 = arith.cmpi ne, %10, %c0_i32_9 : i32
    scf.if %11 {
      %c0_10 = arith.constant 0 : index
      %c0_11 = arith.constant 0 : index
      %12 = vector.load %arg5[%c0_10, %c0_11] : memref<64x72xf32, #tpu.memory_space<vmem>>, vector<64x72xf32>
      %cst_12 = arith.constant 0.000000e+00 : f32
      %13 = vector.broadcast %cst_12 : f32 to vector<64x72xf32>
      %14 = arith.cmpf oge, %12, %13 : vector<64x72xf32>
      %cst_13 = arith.constant 2.000000e-01 : f32
      %15 = vector.broadcast %cst_13 : f32 to vector<64x72xf32>
      %16 = arith.mulf %15, %12 : vector<64x72xf32>
      %17 = arith.select %14, %12, %16 : vector<64x72xi1>, vector<64x72xf32>
      %18 = arith.truncf %17 : vector<64x72xf32> to vector<64x72xbf16>
      %c0_14 = arith.constant 0 : index
      %c0_15 = arith.constant 0 : index
      %19 = vector.load %arg4[%c0_14, %c0_15] : memref<64x72xbf16, #tpu.memory_space<vmem>>, vector<64x72xbf16>
      tpu.vector_store %arg4[%c0_14, %c0_15], %18 {strides = array<i32>} : memref<64x72xbf16, #tpu.memory_space<vmem>>, vector<64x72xbf16>,
    } else {
    }
    return
  }
  func.func @transform_0(%arg0: i32, %arg1: i32) -> (i32, i32) {
    %c0_i32 = arith.constant 0 : i32
    %c0_i32_0 = arith.constant 0 : i32
    return %c0_i32, %arg1 : i32, i32
  }
  func.func @transform_1(%arg0: i32, %arg1: i32) -> (i32, i32) {
    %c0_i32 = arith.constant 0 : i32
    return %arg1, %arg0 : i32, i32
  }
  func.func @transform_2(%arg0: i32, %arg1: i32) -> (i32, i32) {
    %c0_i32 = arith.constant 0 : i32
    %c0_i32_0 = arith.constant 0 : i32
    return %c0_i32, %arg0 : i32, i32
  }
}

module attributes {stable_mosaic.version = 11 : i64} {
  func.func @_gemm_t_kernel(%arg0: i32, %arg1: i32, %arg2: memref<1x1152xbf16, #tpu.memory_space<vmem>>, %arg3: memref<1152x2xbf16, #tpu.memory_space<vmem>>, %arg4: memref<1x1xf32, #tpu.memory_space<vmem>>, %arg5: memref<1x2xf32, #tpu.memory_space<vmem>>) attributes {dimension_semantics = [#tpu.dimension_semantics<parallel>, #tpu.dimension_semantics<arbitrary>], iteration_bounds = array<i64: 1, 2>, scalar_prefetch = 0 : i64, scratch_operands = 1 : i64, tpu.core_type = #tpu.core_type<tc>, window_params = [{transform_indices = @transform_0, window_bounds = array<i64: 1, 1152>}, {transform_indices = @transform_1, window_bounds = array<i64: 1152, 2>}, {pipeline_mode = #tpu.pipeline_mode<synchronous>, transform_indices = @transform_2, window_bounds = array<i64: 1, 1>}]} {
    %c0_i32 = arith.constant 0 : i32
    %0 = arith.cmpi eq, %arg1, %c0_i32 : i32
    %1 = arith.extui %0 : i1 to i32
    %c0_i32_0 = arith.constant 0 : i32
    %2 = arith.cmpi ne, %1, %c0_i32_0 : i32
    scf.if %2 {
      %cst_9 = arith.constant 0.000000e+00 : f32
      %12 = vector.broadcast %cst_9 : f32 to vector<1x2xf32>
      %c0_10 = arith.constant 0 : index
      %c0_11 = arith.constant 0 : index
      %13 = vector.load %arg5[%c0_10, %c0_11] : memref<1x2xf32, #tpu.memory_space<vmem>>, vector<1x2xf32>
      tpu.vector_store %arg5[%c0_10, %c0_11], %12 {strides = array<i32>} : memref<1x2xf32, #tpu.memory_space<vmem>>, vector<1x2xf32>,
    } else {
    }
    %c0 = arith.constant 0 : index
    %c0_1 = arith.constant 0 : index
    %3 = vector.load %arg5[%c0, %c0_1] : memref<1x2xf32, #tpu.memory_space<vmem>>, vector<1x2xf32>
    %c0_2 = arith.constant 0 : index
    %c0_3 = arith.constant 0 : index
    %4 = vector.load %arg2[%c0_2, %c0_3] : memref<1x1152xbf16, #tpu.memory_space<vmem>>, vector<1x1152xbf16>
    %c0_4 = arith.constant 0 : index
    %c0_5 = arith.constant 0 : index
    %5 = vector.load %arg3[%c0_4, %c0_5] : memref<1152x2xbf16, #tpu.memory_space<vmem>>, vector<1152x2xbf16>
    %cst = arith.constant dense<0.000000e+00> : vector<1x2xf32>
    %6 = tpu.matmul %4, %5, %cst {dimension_numbers = #tpu.dot_dimension_numbers<[1], [0], [0], [1], [0, 0, 1, 1], [], []>} : vector<1x1152xbf16>, vector<1152x2xbf16>, vector<1x2xf32> -> vector<1x2xf32>
    %7 = arith.addf %3, %6 : vector<1x2xf32>
    %c0_6 = arith.constant 0 : index
    %c0_7 = arith.constant 0 : index
    %8 = vector.load %arg5[%c0_6, %c0_7] : memref<1x2xf32, #tpu.memory_space<vmem>>, vector<1x2xf32>
    tpu.vector_store %arg5[%c0_6, %c0_7], %7 {strides = array<i32>} : memref<1x2xf32, #tpu.memory_space<vmem>>, vector<1x2xf32>,
    %c1_i32 = arith.constant 1 : i32
    %9 = arith.cmpi eq, %arg1, %c1_i32 : i32
    %10 = arith.extui %9 : i1 to i32
    %c0_i32_8 = arith.constant 0 : i32
    %11 = arith.cmpi ne, %10, %c0_i32_8 : i32
    scf.if %11 {
      %c0_9 = arith.constant 0 : index
      %c0_10 = arith.constant 0 : index
      %12 = vector.load %arg5[%c0_9, %c0_10] : memref<1x2xf32, #tpu.memory_space<vmem>>, vector<1x2xf32>
      %cst_11 = arith.constant dense<0.000000e+00> : vector<1xf32>
      %13 = vector.multi_reduction <add>, %12, %cst_11 [1] : vector<1x2xf32> to vector<1xf32>
      %14 = vector.shape_cast %13 : vector<1xf32> to vector<1x1xf32>
      %cst_12 = arith.constant 2.000000e+00 : f32
      %15 = vector.broadcast %cst_12 : f32 to vector<1x1xf32>
      %16 = arith.divf %14, %15 : vector<1x1xf32>
      %c0_13 = arith.constant 0 : index
      %c0_14 = arith.constant 0 : index
      %17 = vector.load %arg4[%c0_13, %c0_14] : memref<1x1xf32, #tpu.memory_space<vmem>>, vector<1x1xf32>
      tpu.vector_store %arg4[%c0_13, %c0_14], %16 {strides = array<i32>} : memref<1x1xf32, #tpu.memory_space<vmem>>, vector<1x1xf32>,
    } else {
    }
    return
  }
  func.func @transform_0(%arg0: i32, %arg1: i32) -> (i32, i32) {
    %c0_i32 = arith.constant 0 : i32
    %c0_i32_0 = arith.constant 0 : i32
    return %c0_i32, %arg1 : i32, i32
  }
  func.func @transform_1(%arg0: i32, %arg1: i32) -> (i32, i32) {
    %c0_i32 = arith.constant 0 : i32
    return %arg1, %arg0 : i32, i32
  }
  func.func @transform_2(%arg0: i32, %arg1: i32) -> (i32, i32) {
    %c0_i32 = arith.constant 0 : i32
    %c0_i32_0 = arith.constant 0 : i32
    %c0_i32_1 = arith.constant 0 : i32
    return %c0_i32, %c0_i32_0 : i32, i32
  }
}

</mosaic_0001>

<bundles_post_ra>
// kernel: dcgan_d_nobn_forward.5
= control target key start
LH: loop header
LB: loop body
LE: loop exit
PB: predicated region body
PF: predicated region fallthrough
CT: control target
= control target key end

     0   :  { %s1203_s9 = smov 0   ;;  %s1205_s10 = smov 0   ;;  %s1405_s0 = inlined_call_operand.vmem [shape: bf16[8,48], index: 0, kind: input, shape index: {}]   ;;  %s1406_s1 = inlined_call_operand.vmem [shape: bf16[48,4608], index: 1, kind: input, shape index: {}]   ;;  %s1407_s2 = inlined_call_operand.vmem [shape: bf16[8,4608], index: 2, kind: output, shape index: {}]  }
   0x1   :  { %s1207_s11 = smov 0   ;;  %s1209_s12 = smov 0  }
   0x2   :  { %s1211_s13 = smov 0  }
   0x3 LB: > { %s24_s14 = sadd.s32 1, %s1181_s12  ;;  %p66_p1 = scmp.ne.s32.totalorder %s1173_s10, %s1169_s9  ;;  %s1185_s13 = sphi %s1211_s13, %s12_s13   ;;  %s1181_s12 = sphi %s1209_s12, %s1411_s12   ;;  %s1177_s11 = sphi %s1207_s11, %s1410_s11   ;;  %s1173_s10 = sphi %s1205_s10, %s1409_s10   ;;  %s1169_s9 = sphi %s1203_s9, %s1408_s9  }
   0x4   : > { %p26_p0 = scmp.ge.s32.totalorder %s24_s14, 3  ;;  %p67_p2 = scmp.eq.s32.totalorder %s1185_s13, 0 }
   0x5   : > { %s59_s16 = sadd.s32 1, %s1173_s10  ;;  %p989_p5 = scmp.ge.s32.totalorder %s1185_s13, 3 }
   0x6   : > { %s1413_s14 = smov (%p26_p0, %s24_s14), 0  ;;  %p68_p3 = por %p67_p2, %p66_p1 }
   0x7   : > { %s55_s15 = ssub.s32 %s1181_s12, %s1413_s14  ;;  %125 = sbr.rel (%p989_p5) target bundleno = 37 (0x25), region = 20 }
   0x8   : > { %p57_p4 = scmp.eq.s32.totalorder %s55_s15, 0 }
   0xa   : > { %s1238_s17 = scalar_select %p57_p4, %s1173_s10, %s59_s16  }
   0xe   : > { %128 = sbr.rel (!%p68_p3) target bundleno = 37 (0x25), region = 24  ;;  %s130_s18 = sand.u32 (%p68_p3), 1, %s1173_s10  }
   0xf   : > { %s1043_s19 = smul.u32 (%p68_p3), 48, %s1181_s12 }
  0x10   : > { %s1050_s20 = smul.u32 (%p68_p3), 288, %s130_s18 }
  0x11   : > { %s1246_s23 = scalar_lea.vmem (%p68_p3), %s1406_s1, %s1043_s19 }
  0x12   : > { %v151_v0 = vld [vmem:[%s1246_s23] sm:$0xff] (%p68_p3)  ;;  %v153_v1 = vld [vmem:[%s1246_s23 + $0x8] sm:$0xff] (%p68_p3)  ;;  %v155_v2 = vld [vmem:[%s1246_s23 + $0x10] sm:$0xff] (%p68_p3)  ;;  %s1251_s24 = scalar_lea.vmem (%p68_p3), [#allocation3], %s1050_s20 }
  0x13   : > { %152 = vst [vmem:[%s1251_s24] sm:$0xff] (%p68_p3), %v151_v0  ;;  %154 = vst [vmem:[%s1251_s24 + $0x8] sm:$0xff] (%p68_p3), %v153_v1  ;;  %v157_v3 = vld [vmem:[%s1246_s23 + $0x18] sm:$0xff] (%p68_p3)  ;;  %v159_v4 = vld [vmem:[%s1246_s23 + $0x20] sm:$0xff] (%p68_p3) }
  0x14   : > { %156 = vst [vmem:[%s1251_s24 + $0x10] sm:$0xff] (%p68_p3), %v155_v2  ;;  %v161_v5 = vld [vmem:[%s1246_s23 + $0x28] sm:$0xff] (%p68_p3)  ;;  %158 = vst [vmem:[%s1251_s24 + $0x18] sm:$0xff] (%p68_p3), %v157_v3  ;;  %v163_v6 = vld [vmem:[%s1246_s23 + $0x90] sm:$0xff] (%p68_p3) }
  0x15   : > { %160 = vst [vmem:[%s1251_s24 + $0x20] sm:$0xff] %v159_v4  ;;  %162 = vst [vmem:[%s1251_s24 + $0x28] sm:$0xff] %v161_v5  ;;  %v165_v7 = vld [vmem:[%s1246_s23 + $0x98] sm:$0xff]  ;;  %v167_v8 = vld [vmem:[%s1246_s23 + $0xa0] sm:$0xff] }
  0x16   : > { %164 = vst [vmem:[%s1251_s24 + $0x30] sm:$0xff] %v163_v6  ;;  %166 = vst [vmem:[%s1251_s24 + $0x38] sm:$0xff] %v165_v7  ;;  %v169_v9 = vld [vmem:[%s1246_s23 + $0xa8] sm:$0xff]  ;;  %v171_v10 = vld [vmem:[%s1246_s23 + $0xb0] sm:$0xff] }
  0x17   : > { %168 = vst [vmem:[%s1251_s24 + $0x40] sm:$0xff] %v167_v8  ;;  %v173_v11 = vld [vmem:[%s1246_s23 + $0xb8] sm:$0xff]  ;;  %170 = vst [vmem:[%s1251_s24 + $0x48] sm:$0xff] %v169_v9  ;;  %v175_v12 = vld [vmem:[%s1246_s23 + $0x120] sm:$0xff] }
  0x18   : > { %172 = vst [vmem:[%s1251_s24 + $0x50] sm:$0xff] %v171_v10  ;;  %174 = vst [vmem:[%s1251_s24 + $0x58] sm:$0xff] %v173_v11  ;;  %v177_v13 = vld [vmem:[%s1246_s23 + $0x128] sm:$0xff]  ;;  %v179_v14 = vld [vmem:[%s1246_s23 + $0x130] sm:$0xff] }
  0x19   : > { %176 = vst [vmem:[%s1251_s24 + $0x60] sm:$0xff] %v175_v12  ;;  %178 = vst [vmem:[%s1251_s24 + $0x68] sm:$0xff] %v177_v13  ;;  %v181_v15 = vld [vmem:[%s1246_s23 + $0x138] sm:$0xff]  ;;  %v183_v16 = vld [vmem:[%s1246_s23 + $0x140] sm:$0xff] }
  0x1a   : > { %180 = vst [vmem:[%s1251_s24 + $0x70] sm:$0xff] %v179_v14  ;;  %v185_v17 = vld [vmem:[%s1246_s23 + $0x148] sm:$0xff]  ;;  %182 = vst [vmem:[%s1251_s24 + $0x78] sm:$0xff] %v181_v15  ;;  %v187_v18 = vld [vmem:[%s1246_s23 + $0x1b0] sm:$0xff] }
  0x1b   : > { %184 = vst [vmem:[%s1251_s24 + $0x80] sm:$0xff] %v183_v16  ;;  %186 = vst [vmem:[%s1251_s24 + $0x88] sm:$0xff] %v185_v17  ;;  %v189_v19 = vld [vmem:[%s1246_s23 + $0x1b8] sm:$0xff]  ;;  %v191_v20 = vld [vmem:[%s1246_s23 + $0x1c0] sm:$0xff] }
  0x1c   : > { %188 = vst [vmem:[%s1251_s24 + $0x90] sm:$0xff] %v187_v18  ;;  %190 = vst [vmem:[%s1251_s24 + $0x98] sm:$0xff] %v189_v19  ;;  %v193_v21 = vld [vmem:[%s1246_s23 + $0x1c8] sm:$0xff]  ;;  %v195_v22 = vld [vmem:[%s1246_s23 + $0x1d0] sm:$0xff] }
  0x1d   : > { %192 = vst [vmem:[%s1251_s24 + $0xa0] sm:$0xff] %v191_v20  ;;  %v197_v23 = vld [vmem:[%s1246_s23 + $0x1d8] sm:$0xff]  ;;  %194 = vst [vmem:[%s1251_s24 + $0xa8] sm:$0xff] %v193_v21  ;;  %v199_v24 = vld [vmem:[%s1246_s23 + $0x240] sm:$0xff] }
  0x1e   : > { %196 = vst [vmem:[%s1251_s24 + $0xb0] sm:$0xff] %v195_v22  ;;  %198 = vst [vmem:[%s1251_s24 + $0xb8] sm:$0xff] %v197_v23  ;;  %v201_v25 = vld [vmem:[%s1246_s23 + $0x248] sm:$0xff]  ;;  %v203_v26 = vld [vmem:[%s1246_s23 + $0x250] sm:$0xff] }
  0x1f   : > { %200 = vst [vmem:[%s1251_s24 + $0xc0] sm:$0xff] %v199_v24  ;;  %202 = vst [vmem:[%s1251_s24 + $0xc8] sm:$0xff] %v201_v25  ;;  %v205_v27 = vld [vmem:[%s1246_s23 + $0x258] sm:$0xff]  ;;  %v207_v28 = vld [vmem:[%s1246_s23 + $0x260] sm:$0xff] }
  0x20   : > { %204 = vst [vmem:[%s1251_s24 + $0xd0] sm:$0xff] %v203_v26  ;;  %v209_v29 = vld [vmem:[%s1246_s23 + $0x268] sm:$0xff]  ;;  %206 = vst [vmem:[%s1251_s24 + $0xd8] sm:$0xff] %v205_v27  ;;  %v211_v30 = vld [vmem:[%s1246_s23 + $0x2d0] sm:$0xff] }
  0x21   : > { %208 = vst [vmem:[%s1251_s24 + $0xe0] sm:$0xff] %v207_v28  ;;  %210 = vst [vmem:[%s1251_s24 + $0xe8] sm:$0xff] %v209_v29  ;;  %v213_v31 = vld [vmem:[%s1246_s23 + $0x2d8] sm:$0xff]  ;;  %v215_v32 = vld [vmem:[%s1246_s23 + $0x2e0] sm:$0xff] }
  0x22   : > { %212 = vst [vmem:[%s1251_s24 + $0xf0] sm:$0xff] %v211_v30  ;;  %214 = vst [vmem:[%s1251_s24 + $0xf8] sm:$0xff] %v213_v31  ;;  %v217_v33 = vld [vmem:[%s1246_s23 + $0x2e8] sm:$0xff]  ;;  %v219_v34 = vld [vmem:[%s1246_s23 + $0x2f0] sm:$0xff] }
  0x23   : > { %216 = vst [vmem:[%s1251_s24 + $0x100] sm:$0xff] %v215_v32  ;;  %v221_v35 = vld [vmem:[%s1246_s23 + $0x2f8] sm:$0xff]  ;;  %218 = vst [vmem:[%s1251_s24 + $0x108] sm:$0xff] %v217_v33 }
  0x24   : > { %220 = vst [vmem:[%s1251_s24 + $0x110] sm:$0xff] %v219_v34  ;;  %222 = vst [vmem:[%s1251_s24 + $0x118] sm:$0xff] %v221_v35 }
  0x25 PF: > { %p991_p6 = scmp.ge.s32.totalorder %s1185_s13, 1  ;;  %p227_p7 = scmp.lt.s32.totalorder %s1185_s13, 4 }
  0x27   : > { %p228_p8 = pnand %p991_p6, %p227_p7 }
  0x28   : > { %s234_s25 = sand.u32 (!%p228_p8), 1, %s1169_s9   ;;  %v1187_v36 = vmov (!%p228_p8), 0   ;;  %v300_v50 = vld [vmem:[%s1405_s0] sm:$0xf] (!%p228_p8)  ;;  %vm517_vm0 = vcmask (!%p228_p8), 392192   ;;  %s265_s30 = smul.u32 (!%p228_p8), 12, %s1177_s11 }
  0x29   : > { %231 = sbr.rel (%p228_p8) target bundleno = 303 (0x12f), region = 47  ;;  %553 = vmatprep.mubr.bf16.mxu0 (!%p228_p8), %v1187_v36  ;;  %594 = vmatprep.mubr.bf16.mxu1 (!%p228_p8), %v1187_v36 }
  0x2a   : > { %s1051_s26 = smul.u32 (!%p228_p8), 288, %s234_s25  ;;  %p266_p9 = scmp.lt.s32.totalorder (!%p228_p8), %s265_s30, 35 }
  0x2c   : > { %s1327_s27 = scalar_lea.vmem (!%p228_p8), [#allocation3], %s1051_s26 }
  0x2d   : > { %v1093_v37 = vld [vmem:[%s1327_s27 + $0x4] ss:$48 sps:$4 sm:$0xff] (!%p228_p8)   ;;  %v1095_v38 = vld [vmem:[%s1327_s27 + $0xc] ss:$48 sps:$4 sm:$0xff] (!%p228_p8)   ;;  %v1097_v39 = vld [vmem:[%s1327_s27] ss:$48 sps:$4 sm:$0xff] (!%p228_p8)  }
  0x2e   : > { %521 = vmatprep.subr.bf16.mxu0 (!%p228_p8), %v1093_v37  ;;  %v1098_v40 = vld [vmem:[%s1327_s27 + $0x8] ss:$48 sps:$4 sm:$0xff] (!%p228_p8)   ;;  %562 = vmatprep.subr.bf16.mxu1 (!%p228_p8), %v1095_v38  ;;  %v1099_v41 = vld [vmem:[%s1327_s27 + $0x64] ss:$48 sps:$4 sm:$0xff] (!%p228_p8)   ;;  %v1101_v42 = vld [vmem:[%s1327_s27 + $0x6c] ss:$48 sps:$4 sm:$0xff] (!%p228_p8)  }
  0x2f   : > { %522 = vmatpush1.bf16.msra.mxu0 (!%p228_p8), %v1097_v39  ;;  %563 = vmatpush1.bf16.msra.mxu1 (!%p228_p8), %v1098_v40  ;;  %v1103_v43 = vld [vmem:[%s1327_s27 + $0x60] ss:$48 sps:$4 sm:$0xff] (!%p228_p8)   ;;  %v1104_v44 = vld [vmem:[%s1327_s27 + $0x68] ss:$48 sps:$4 sm:$0xff] (!%p228_p8)   ;;  %v1105_v45 = vld [vmem:[%s1327_s27 + $0xc4] ss:$48 sps:$4 sm:$0xff] (!%p228_p8)  }
  0x30   : > { %523 = vmatprep.subr.bf16.mxu0 %v1099_v41  ;;  %564 = vmatprep.subr.bf16.mxu1 %v1101_v42  ;;  %v1107_v46 = vld [vmem:[%s1327_s27 + $0xcc] ss:$48 sps:$4 sm:$0xff]   ;;  %v1109_v47 = vld [vmem:[%s1327_s27 + $0xc0] ss:$48 sps:$4 sm:$0xff]   ;;  %v1110_v48 = vld [vmem:[%s1327_s27 + $0xc8] ss:$48 sps:$4 sm:$0xff]  }
  0x31   : > { %v1113_v49 = vld [vmem:[%s1327_s27 + $0x14] ss:$48 sps:$4 sm:$0xff]   ;;  %v1116_v51 = vld [vmem:[%s1327_s27 + $0x1c] ss:$48 sps:$4 sm:$0xff]   ;;  %v1111_v52 = vld [vmem:[%s1327_s27 + $0x10] ss:$48 sps:$4 sm:$0xff]  }
  0x32   : > { %v1114_v53 = vld [vmem:[%s1327_s27 + $0x18] ss:$48 sps:$4 sm:$0xff]   ;;  %v1119_v54 = vld [vmem:[%s1327_s27 + $0x74] ss:$48 sps:$4 sm:$0xff]   ;;  %v1122_v55 = vld [vmem:[%s1327_s27 + $0x7c] ss:$48 sps:$4 sm:$0xff]  }
  0x33   : > { %524 = vmatpush1.bf16.msra.mxu0 %v1103_v43  ;;  %565 = vmatpush1.bf16.msra.mxu1 %v1104_v44  ;;  %v1117_v56 = vld [vmem:[%s1327_s27 + $0x70] ss:$48 sps:$4 sm:$0xff]   ;;  %v1120_v57 = vld [vmem:[%s1327_s27 + $0x78] ss:$48 sps:$4 sm:$0xff]   ;;  %v1125_v58 = vld [vmem:[%s1327_s27 + $0xd4] ss:$48 sps:$4 sm:$0xff]  }
  0x34   : > { %525 = vmatprep.subr.bf16.mxu0 %v1105_v45  ;;  %566 = vmatprep.subr.bf16.mxu1 %v1107_v46  ;;  %v1128_v59 = vld [vmem:[%s1327_s27 + $0xdc] ss:$48 sps:$4 sm:$0xff]   ;;  %v1123_v60 = vld [vmem:[%s1327_s27 + $0xd0] ss:$48 sps:$4 sm:$0xff]   ;;  %v1126_v61 = vld [vmem:[%s1327_s27 + $0xd8] ss:$48 sps:$4 sm:$0xff]  }
  0x35   : > { %v1131_v62 = vld [vmem:[%s1327_s27 + $0x24] ss:$48 sps:$4 sm:$0xff]   ;;  %v1134_v63 = vld [vmem:[%s1327_s27 + $0x2c] ss:$48 sps:$4 sm:$0xff]   ;;  %v1129_v0 = vld [vmem:[%s1327_s27 + $0x20] ss:$48 sps:$4 sm:$0xff]  }
  0x36   : > { %v1132_v1 = vld [vmem:[%s1327_s27 + $0x28] ss:$48 sps:$4 sm:$0xff]   ;;  %v1137_v2 = vld [vmem:[%s1327_s27 + $0x84] ss:$48 sps:$4 sm:$0xff]   ;;  %v1140_v3 = vld [vmem:[%s1327_s27 + $0x8c] ss:$48 sps:$4 sm:$0xff]  }
  0x37   : > { %526 = vmatpush1.bf16.msra.mxu0 %v1109_v47  ;;  %567 = vmatpush1.bf16.msra.mxu1 %v1110_v48  ;;  %v1135_v4 = vld [vmem:[%s1327_s27 + $0x80] ss:$48 sps:$4 sm:$0xff]   ;;  %v1138_v5 = vld [vmem:[%s1327_s27 + $0x88] ss:$48 sps:$4 sm:$0xff]   ;;  %v1143_v6 = vld [vmem:[%s1327_s27 + $0xe4] ss:$48 sps:$4 sm:$0xff]  }
  0x38   : > { %603 = vmatprep.subr.bf16.mxu0 %v1113_v49  ;;  %644 = vmatprep.subr.bf16.mxu1 %v1116_v51  ;;  %v1146_v7 = vld [vmem:[%s1327_s27 + $0xec] ss:$48 sps:$4 sm:$0xff]   ;;  %v1141_v8 = vld [vmem:[%s1327_s27 + $0xe0] ss:$48 sps:$4 sm:$0xff]   ;;  %v1144_v9 = vld [vmem:[%s1327_s27 + $0xe8] ss:$48 sps:$4 sm:$0xff]  }
  0x39   : > { %s1415_s30 = smov (!%p266_p9, %s265_s30), 35 }
  0x3a   : > { %1029 = vmatmul.mubr.msk.bf16.vlgmr.msra.gmra.mrb[0].mxu0 %vm517_vm0, %v300_v50  ;;  %1030 = vmatmul.mubr.msk.bf16.vlgmr.msra.gmra.mrb[0].mxu1 %vm517_vm0, %v300_v50  ;;  %s992_s3 = sshll.u32 %s1415_s30, 2 }
  0x3b   : > { %604 = vmatpush1.bf16.msra.mxu0 %v1111_v52  ;;  %645 = vmatpush1.bf16.msra.mxu1 %v1114_v53  ;;  %s1382_s6 = scalar_lea.vmem %s1407_s2, %s992_s3 }
  0x3c   : > { %605 = vmatprep.subr.bf16.mxu0 %v1119_v54  ;;  %646 = vmatprep.subr.bf16.mxu1 %v1122_v55 }
  0x3d   : > { %635 = vmatprep.mubr.bf16.mxu0 %v1187_v36  ;;  %676 = vmatprep.mubr.bf16.mxu1 %v1187_v36 }
  0x3f   : > { %606 = vmatpush1.bf16.msra.mxu0 %v1117_v56  ;;  %647 = vmatpush1.bf16.msra.mxu1 %v1120_v57 }
  0x40   : > { %607 = vmatprep.subr.bf16.mxu0 %v1125_v58  ;;  %648 = vmatprep.subr.bf16.mxu1 %v1128_v59 }
  0x43   : > { %608 = vmatpush1.bf16.msra.mxu0 %v1123_v60  ;;  %649 = vmatpush1.bf16.msra.mxu1 %v1126_v61 }
  0x44   : > { %685 = vmatprep.subr.bf16.mxu0 %v1131_v62  ;;  %726 = vmatprep.subr.bf16.mxu1 %v1134_v63 }
  0x46   : > { %1031 = vmatmul.mubr.msk.bf16.vlgmr.msra.gmra.mrb[4].mxu0 %vm517_vm0, %v300_v50  ;;  %1032 = vmatmul.mubr.msk.bf16.vlgmr.msra.gmra.mrb[4].mxu1 %vm517_vm0, %v300_v50 }
  0x47   : > { %686 = vmatpush1.bf16.msra.mxu0 %v1129_v0  ;;  %727 = vmatpush1.bf16.msra.mxu1 %v1132_v1 }
  0x48   : > { %687 = vmatprep.subr.bf16.mxu0 %v1137_v2  ;;  %728 = vmatprep.subr.bf16.mxu1 %v1140_v3 }
  0x49   : > { %717 = vmatprep.mubr.bf16.mxu0 %v1187_v36  ;;  %758 = vmatprep.mubr.bf16.mxu1 %v1187_v36 }
  0x4b   : > { %688 = vmatpush1.bf16.msra.mxu0 %v1135_v4  ;;  %729 = vmatpush1.bf16.msra.mxu1 %v1138_v5 }
  0x4c   : > { %689 = vmatprep.subr.bf16.mxu0 %v1143_v6  ;;  %730 = vmatprep.subr.bf16.mxu1 %v1146_v7 }
  0x4f   : > { %690 = vmatpush1.bf16.msra.mxu0 %v1141_v8  ;;  %731 = vmatpush1.bf16.msra.mxu1 %v1144_v9 }
  0x52   : > { %1033 = vmatmul.mubr.msk.bf16.vlgmr.msra.gmra.mrb[8].mxu0 %vm517_vm0, %v300_v50  ;;  %1034 = vmatmul.mubr.msk.bf16.vlgmr.msra.gmra.mrb[8].mxu1 %vm517_vm0, %v300_v50 }
 0x10d   : > { %v555_v10 = vpop.f32.mrb[0].mxu0  ;;  %v596_v11 = vpop.f32.mrb[0].mxu1 }
 0x10e   : > { %vm806_vm1 = vcmp.ge.f32.partialorder %v555_v10, 0.0  ;;  %v818_v12 = vmul.f32 0.2, %v555_v10  ;;  %vm808_vm2 = vcmp.ge.f32.partialorder %v596_v11, 0.0  ;;  %v820_v13 = vmul.f32 0.2, %v596_v11 }
 0x10f   : > { %v557_v14 = vpop.f32.mrb[1].mxu0  ;;  %v598_v15 = vpop.f32.mrb[1].mxu1 }
 0x110   : > { %v830_v16 = vsel %vm806_vm1, %v555_v10, %v818_v12  ;;  %vm807_vm3 = vcmp.ge.f32.partialorder %v557_v14, 0.0  ;;  %v819_v17 = vmul.f32 0.2, %v557_v14  ;;  %v559_v18 = vpop.f32.mrb[2].mxu0  ;;  %v600_v19 = vpop.f32.mrb[2].mxu1  ;;  %v832_v20 = vsel %vm808_vm2, %v596_v11, %v820_v13 }
 0x111   : > { %vm809_vm4 = vcmp.ge.f32.partialorder %v598_v15, 0.0  ;;  %v821_v21 = vmul.f32 0.2, %v598_v15  ;;  %v560_v22 = vpop.f32.mrb[3].mxu0  ;;  %v601_v23 = vpop.f32.mrb[3].mxu1 }
 0x112   : > { %v831_v24 = vsel %vm807_vm3, %v557_v14, %v819_v17 }
 0x113   : > { %v1044_v25 = vpack.c.bf16 %v831_v24, %v830_v16  ;;  %v833_v26 = vsel %vm809_vm4, %v598_v15, %v821_v21 }
 0x114   : > { %v1045_v27 = vpack.c.bf16 %v833_v26, %v832_v20 }
 0x115   : > { %890 = vst [vmem:[%s1382_s6] sm:$0xff] %v1044_v25 }
 0x116   : > { %891 = vst [vmem:[%s1382_s6 + $0x8] sm:$0xff] %v1045_v27 }
 0x119   : > { %v637_v28 = vpop.f32.mrb[4].mxu0  ;;  %v678_v29 = vpop.f32.mrb[4].mxu1 }
 0x11a   : > { %vm810_vm5 = vcmp.ge.f32.partialorder %v637_v28, 0.0  ;;  %v822_v30 = vmul.f32 0.2, %v637_v28  ;;  %vm812_vm6 = vcmp.ge.f32.partialorder %v678_v29, 0.0  ;;  %v824_v31 = vmul.f32 0.2, %v678_v29 }
 0x11b   : > { %v639_v32 = vpop.f32.mrb[5].mxu0  ;;  %v680_v33 = vpop.f32.mrb[5].mxu1 }
 0x11c   : > { %v834_v34 = vsel %vm810_vm5, %v637_v28, %v822_v30  ;;  %vm811_vm7 = vcmp.ge.f32.partialorder %v639_v32, 0.0  ;;  %v823_v35 = vmul.f32 0.2, %v639_v32  ;;  %v641_v36 = vpop.f32.mrb[6].mxu0  ;;  %v682_v37 = vpop.f32.mrb[6].mxu1  ;;  %v836_v38 = vsel %vm812_vm6, %v678_v29, %v824_v31 }
 0x11d   : > { %vm813_vm8 = vcmp.ge.f32.partialorder %v680_v33, 0.0  ;;  %v825_v39 = vmul.f32 0.2, %v680_v33  ;;  %v642_v40 = vpop.f32.mrb[7].mxu0  ;;  %v683_v41 = vpop.f32.mrb[7].mxu1 }
 0x11e   : > { %v835_v42 = vsel %vm811_vm7, %v639_v32, %v823_v35 }
 0x11f   : > { %v1046_v43 = vpack.c.bf16 %v835_v42, %v834_v34  ;;  %v837_v44 = vsel %vm813_vm8, %v680_v33, %v825_v39 }
 0x120   : > { %v1047_v45 = vpack.c.bf16 %v837_v44, %v836_v38 }
 0x121   : > { %892 = vst [vmem:[%s1382_s6 + $0x10] sm:$0xff] %v1046_v43 }
 0x122   : > { %893 = vst [vmem:[%s1382_s6 + $0x18] sm:$0xff] %v1047_v45 }
 0x125   : > { %v719_v46 = vpop.f32.mrb[8].mxu0  ;;  %v760_v47 = vpop.f32.mrb[8].mxu1 }
 0x126   : > { %vm814_vm9 = vcmp.ge.f32.partialorder %v719_v46, 0.0  ;;  %v826_v48 = vmul.f32 0.2, %v719_v46  ;;  %vm816_vm10 = vcmp.ge.f32.partialorder %v760_v47, 0.0  ;;  %v828_v49 = vmul.f32 0.2, %v760_v47 }
 0x127   : > { %v721_v50 = vpop.f32.mrb[9].mxu0  ;;  %v762_v51 = vpop.f32.mrb[9].mxu1 }
 0x128   : > { %v838_v52 = vsel %vm814_vm9, %v719_v46, %v826_v48  ;;  %vm815_vm11 = vcmp.ge.f32.partialorder %v721_v50, 0.0  ;;  %v827_v53 = vmul.f32 0.2, %v721_v50  ;;  %v723_v54 = vpop.f32.mrb[10].mxu0  ;;  %v764_v55 = vpop.f32.mrb[10].mxu1  ;;  %v840_v56 = vsel %vm816_vm10, %v760_v47, %v828_v49 }
 0x129   : > { %vm817_vm12 = vcmp.ge.f32.partialorder %v762_v51, 0.0  ;;  %v829_v57 = vmul.f32 0.2, %v762_v51  ;;  %v724_v58 = vpop.f32.mrb[11].mxu0  ;;  %v765_v59 = vpop.f32.mrb[11].mxu1 }
 0x12a   : > { %v839_v60 = vsel %vm815_vm11, %v721_v50, %v827_v53 }
 0x12b   : > { %v1048_v61 = vpack.c.bf16 %v839_v60, %v838_v52  ;;  %v841_v62 = vsel %vm817_vm12, %v762_v51, %v829_v57 }
 0x12c   : > { %v1049_v63 = vpack.c.bf16 %v841_v62, %v840_v56 }
 0x12d   : > { %894 = vst [vmem:[%s1382_s6 + $0x20] sm:$0xff] %v1048_v61 }
 0x12e   : > { %895 = vst [vmem:[%s1382_s6 + $0x28] sm:$0xff] %v1049_v63 }
 0x12f PF: > { %s12_s13 = sadd.s32 1, %s1185_s13   ;;  %s1408_s9 = smov %s1173_s10 }
 0x130   : > { %p9_p10 = scmp.ge.s32.totalorder %s12_s13, 5   ;;  %s1409_s10 = smov %s1238_s17 }
 0x131   : > { %s1410_s11 = smov %s1181_s12  ;;  %s1411_s12 = smov %s1413_s14 }
 0x132   :  { %11 = sbr.rel (!%p9_p10) target bundleno = 3 (0x3), region = 97 }

// kernel: dcgan_d_nobn_forward.6
= control target key start
LH: loop header
LB: loop body
LE: loop exit
PB: predicated region body
PF: predicated region fallthrough
CT: control target
= control target key end

     0   :  { %s978_s9 = smov 0   ;;  %s980_s10 = smov 0   ;;  %s1151_s0 = inlined_call_operand.vmem [shape: bf16[16,128], index: 0, kind: input, shape index: {}]   ;;  %s1152_s1 = inlined_call_operand.vmem [shape: bf16[128,1152], index: 1, kind: input, shape index: {}]   ;;  %s1153_s2 = inlined_call_operand.vmem [shape: bf16[16,1152], index: 2, kind: output, shape index: {}]  }
   0x1   :  { %s982_s11 = smov 0   ;;  %s984_s12 = smov 0  }
   0x2   :  { %s986_s13 = smov 0  }
   0x3 LB: > { %s24_s14 = sadd.s32 1, %s954_s12  ;;  %s731_s15 = sadd.s32 4294967295, %s958_s13   ;;  %s958_s13 = sphi %s986_s13, %s12_s13   ;;  %s954_s12 = sphi %s984_s12, %s1158_s12   ;;  %s950_s11 = sphi %s982_s11, %s1157_s11   ;;  %s946_s10 = sphi %s980_s10, %s1156_s10   ;;  %s942_s9 = sphi %s978_s9, %s1155_s9  }
   0x4   : > { %p26_p0 = scmp.ge.s32.totalorder %s24_s14, 3  ;;  %p66_p1 = scmp.ne.s32.totalorder %s946_s10, %s942_s9 }
   0x5   : > { %p67_p2 = scmp.eq.s32.totalorder %s958_s13, 0  ;;  %p96_p4 = scmp.eq.s32.totalorder %s731_s15, 2 }
   0x6   : > { %s1160_s14 = smov (%p26_p0, %s24_s14), 0  ;;  %s59_s17 = sadd.s32 1, %s946_s10 }
   0x7   : > { %p68_p3 = por %p67_p2, %p66_p1  ;;  %s55_s16 = ssub.s32 %s954_s12, %s1160_s14 }
   0x8   : > { %p57_p5 = scmp.eq.s32.totalorder %s55_s16, 0  ;;  %p1013_p6 = por %p96_p4, %p66_p1 }
   0x9   : > { %p735_p7 = scmp.ge.s32.totalorder %s958_s13, 3 }
   0xa   : > { %s1018_s19 = scalar_select %p57_p5, %s946_s10, %s59_s17  }
   0xb   : > { %125 = sbr.rel (%p735_p7) target bundleno = 41 (0x29), region = 20 }
  0x12   : > { %128 = sbr.rel (!%p68_p3) target bundleno = 41 (0x29), region = 24  ;;  %s130_s20 = sand.u32 (%p68_p3), 1, %s946_s10  }
  0x13   : > { %s806_s21 = smul.u32 (%p68_p3), 12, %s954_s12 }
  0x14   : > { %s841_s22 = smul.u32 (%p68_p3), 192, %s130_s20 }
  0x15   : > { %s1026_s25 = scalar_lea.vmem (%p68_p3), %s1152_s1, %s806_s21 }
  0x16   : > { %v153_v0 = vld [vmem:[%s1026_s25] sm:$0xff] (%p68_p3)  ;;  %v157_v2 = vld [vmem:[%s1026_s25 + $0x48] sm:$0xff] (%p68_p3)  ;;  %s1031_s26 = scalar_lea.vmem (%p68_p3), [#allocation3], %s841_s22  ;;  %v161_v4 = vld [vmem:[%s1026_s25 + $0x90] sm:$0xff] (%p68_p3) }
  0x17   : > { %v155_v1 = vld [vmem:[%s1026_s25 + $0x24] sm:$0xff] (%p68_p3)  ;;  %154 = vst [vmem:[%s1031_s26] sm:$0xff] (%p68_p3), %v153_v0  ;;  %158 = vst [vmem:[%s1031_s26 + $0x18] sm:$0xff] (%p68_p3), %v157_v2  ;;  %v159_v3 = vld [vmem:[%s1026_s25 + $0x6c] sm:$0xff] (%p68_p3) }
  0x18   : > { %156 = vst [vmem:[%s1031_s26 + $0xc] sm:$0xff] (%p68_p3), %v155_v1  ;;  %v163_v5 = vld [vmem:[%s1026_s25 + $0xb4] sm:$0xff] (%p68_p3)  ;;  %160 = vst [vmem:[%s1031_s26 + $0x24] sm:$0xff] (%p68_p3), %v159_v3  ;;  %v167_v7 = vld [vmem:[%s1026_s25 + $0xfc] sm:$0xff] (%p68_p3) }
  0x19   : > { %162 = vst [vmem:[%s1031_s26 + $0x30] sm:$0xff] %v161_v4  ;;  %164 = vst [vmem:[%s1031_s26 + $0x3c] sm:$0xff] %v163_v5  ;;  %v165_v6 = vld [vmem:[%s1026_s25 + $0xd8] sm:$0xff]  ;;  %v169_v8 = vld [vmem:[%s1026_s25 + $0x120] sm:$0xff] }
  0x1a   : > { %166 = vst [vmem:[%s1031_s26 + $0x48] sm:$0xff] %v165_v6  ;;  %168 = vst [vmem:[%s1031_s26 + $0x54] sm:$0xff] %v167_v7  ;;  %v171_v9 = vld [vmem:[%s1026_s25 + $0x144] sm:$0xff]  ;;  %v175_v11 = vld [vmem:[%s1026_s25 + $0x18c] sm:$0xff] }
  0x1b   : > { %170 = vst [vmem:[%s1031_s26 + $0x60] sm:$0xff] %v169_v8  ;;  %v173_v10 = vld [vmem:[%s1026_s25 + $0x168] sm:$0xff]  ;;  %172 = vst [vmem:[%s1031_s26 + $0x6c] sm:$0xff] %v171_v9  ;;  %v177_v12 = vld [vmem:[%s1026_s25 + $0x1b0] sm:$0xff] }
  0x1c   : > { %174 = vst [vmem:[%s1031_s26 + $0x78] sm:$0xff] %v173_v10  ;;  %176 = vst [vmem:[%s1031_s26 + $0x84] sm:$0xff] %v175_v11  ;;  %v179_v13 = vld [vmem:[%s1026_s25 + $0x1d4] sm:$0xff]  ;;  %v183_v15 = vld [vmem:[%s1026_s25 + $0x21c] sm:$0xff] }
  0x1d   : > { %v181_v14 = vld [vmem:[%s1026_s25 + $0x1f8] sm:$0xff]  ;;  %178 = vst [vmem:[%s1031_s26 + $0x90] sm:$0xff] %v177_v12  ;;  %180 = vst [vmem:[%s1031_s26 + $0x9c] sm:$0xff] %v179_v13  ;;  %v737_v16 = vld [vmem:[%s1026_s25 + $0x8] sm:$0xf] }
  0x1e   : > { %182 = vst [vmem:[%s1031_s26 + $0xa8] sm:$0xff] %v181_v14  ;;  %v739_v17 = vld [vmem:[%s1026_s25 + $0x2c] sm:$0xf]  ;;  %184 = vst [vmem:[%s1031_s26 + $0xb4] sm:$0xff] %v183_v15  ;;  %v741_v18 = vld [vmem:[%s1026_s25 + $0x50] sm:$0xf] }
  0x1f   : > { %738 = vst [vmem:[%s1031_s26 + $0x8] sm:$0xf] %v737_v16  ;;  %740 = vst [vmem:[%s1031_s26 + $0x14] sm:$0xf] %v739_v17  ;;  %v743_v19 = vld [vmem:[%s1026_s25 + $0x74] sm:$0xf] }
  0x20   : > { %v745_v20 = vld [vmem:[%s1026_s25 + $0x98] sm:$0xf]  ;;  %742 = vst [vmem:[%s1031_s26 + $0x20] sm:$0xf] %v741_v18  ;;  %744 = vst [vmem:[%s1031_s26 + $0x2c] sm:$0xf] %v743_v19 }
  0x21   : > { %746 = vst [vmem:[%s1031_s26 + $0x38] sm:$0xf] %v745_v20  ;;  %v747_v21 = vld [vmem:[%s1026_s25 + $0xbc] sm:$0xf]  ;;  %v749_v22 = vld [vmem:[%s1026_s25 + $0xe0] sm:$0xf] }
  0x22   : > { %v751_v23 = vld [vmem:[%s1026_s25 + $0x104] sm:$0xf]  ;;  %748 = vst [vmem:[%s1031_s26 + $0x44] sm:$0xf] %v747_v21  ;;  %750 = vst [vmem:[%s1031_s26 + $0x50] sm:$0xf] %v749_v22 }
  0x23   : > { %752 = vst [vmem:[%s1031_s26 + $0x5c] sm:$0xf] %v751_v23  ;;  %v753_v24 = vld [vmem:[%s1026_s25 + $0x128] sm:$0xf]  ;;  %v755_v25 = vld [vmem:[%s1026_s25 + $0x14c] sm:$0xf] }
  0x24   : > { %v757_v26 = vld [vmem:[%s1026_s25 + $0x170] sm:$0xf]  ;;  %754 = vst [vmem:[%s1031_s26 + $0x68] sm:$0xf] %v753_v24  ;;  %756 = vst [vmem:[%s1031_s26 + $0x74] sm:$0xf] %v755_v25 }
  0x25   : > { %758 = vst [vmem:[%s1031_s26 + $0x80] sm:$0xf] %v757_v26  ;;  %v759_v27 = vld [vmem:[%s1026_s25 + $0x194] sm:$0xf]  ;;  %v761_v28 = vld [vmem:[%s1026_s25 + $0x1b8] sm:$0xf] }
  0x26   : > { %v763_v29 = vld [vmem:[%s1026_s25 + $0x1dc] sm:$0xf]  ;;  %760 = vst [vmem:[%s1031_s26 + $0x8c] sm:$0xf] %v759_v27  ;;  %762 = vst [vmem:[%s1031_s26 + $0x98] sm:$0xf] %v761_v28 }
  0x27   : > { %764 = vst [vmem:[%s1031_s26 + $0xa4] sm:$0xf] %v763_v29  ;;  %v765_v30 = vld [vmem:[%s1026_s25 + $0x200] sm:$0xf]  ;;  %v767_v31 = vld [vmem:[%s1026_s25 + $0x224] sm:$0xf] }
  0x28   : > { %766 = vst [vmem:[%s1031_s26 + $0xb0] sm:$0xf] %v765_v30  ;;  %768 = vst [vmem:[%s1031_s26 + $0xbc] sm:$0xf] %v767_v31 }
  0x29 PF: > { %p769_p8 = scmp.ge.s32.totalorder %s958_s13, 1  ;;  %p228_p9 = scmp.lt.s32.totalorder %s958_s13, 4 }
  0x2b   : > { %p229_p10 = pnand %p769_p8, %p228_p9 }
  0x2c   : > { %s235_s27 = sand.u32 (!%p229_p10), 1, %s942_s9   ;;  %v960_v32 = vmov (!%p229_p10), 0.0   ;;  %vm961_vm0 = vmmov (!%p229_p10), 0   ;;  %v962_v33 = vmov (!%p229_p10), 0   ;;  %v919_v58 = vld [vmem:[%s1151_s0] sm:$0xff] (!%p229_p10)  }
  0x2d   : > { %232 = sbr.rel (%p229_p10) target bundleno = 311 (0x137), region = 50  ;;  %821 = vmatprep.subr.bf16.mxu1 (!%p229_p10), %v960_v32  ;;  %837 = vmatprep.mubr.msk.bf16.mxu1 (!%p229_p10), %vm961_vm0, %v960_v32 }
  0x2e   : > { %s842_s28 = smul.u32 (!%p229_p10), 192, %s235_s27  ;;  %483 = vmatprep.mubr.bf16.mxu0 (!%p229_p10), %v962_v33 }
  0x2f   : > { %s843_s4 = smul.u32 (!%p229_p10), 24, %s235_s27 }
  0x30   : > { %s1099_s29 = scalar_lea.vmem (!%p229_p10), [#allocation3], %s842_s28 }
  0x31   : > { %v887_v34 = vld [vmem:[%s1099_s29 + $0x4] ss:$12 sps:$4 sm:$0xff] (!%p229_p10)   ;;  %v889_v35 = vld [vmem:[%s1099_s29 + $0x8] ss:$12 sps:$4 sm:$0xff] (!%p229_p10)   ;;  %v890_v36 = vld [vmem:[%s1099_s29] ss:$12 sps:$4 sm:$0xff] (!%p229_p10)  }
  0x32   : > { %451 = vmatprep.subr.bf16.mxu0 (!%p229_p10), %v887_v34  ;;  %822 = vmatpush3.bf16.msra.mxu1 (!%p229_p10), %v889_v35  ;;  %v891_v37 = vld [vmem:[%s1099_s29 + $0x1c] ss:$12 sps:$4 sm:$0xff] (!%p229_p10)   ;;  %v893_v38 = vld [vmem:[%s1099_s29 + $0x20] ss:$12 sps:$4 sm:$0xff] (!%p229_p10)   ;;  %v894_v39 = vld [vmem:[%s1099_s29 + $0x18] ss:$12 sps:$4 sm:$0xff] (!%p229_p10)  }
  0x33   : > { %452 = vmatpush1.bf16.msra.mxu0 (!%p229_p10), %v890_v36  ;;  %823 = vmatprep.subr.bf16.mxu1 (!%p229_p10), %v960_v32  ;;  %v895_v40 = vld [vmem:[%s1099_s29 + $0x34] ss:$12 sps:$4 sm:$0xff] (!%p229_p10)   ;;  %v897_v41 = vld [vmem:[%s1099_s29 + $0x38] ss:$12 sps:$4 sm:$0xff] (!%p229_p10)   ;;  %v898_v42 = vld [vmem:[%s1099_s29 + $0x30] ss:$12 sps:$4 sm:$0xff] (!%p229_p10)  }
  0x34   : > { %453 = vmatprep.subr.bf16.mxu0 %v891_v37  ;;  %v899_v43 = vld [vmem:[%s1099_s29 + $0x4c] ss:$12 sps:$4 sm:$0xff]   ;;  %v901_v44 = vld [vmem:[%s1099_s29 + $0x50] ss:$12 sps:$4 sm:$0xff]   ;;  %v902_v45 = vld [vmem:[%s1099_s29 + $0x48] ss:$12 sps:$4 sm:$0xff]  }
  0x35   : > { %v903_v46 = vld [vmem:[%s1099_s29 + $0x64] ss:$12 sps:$4 sm:$0xff]   ;;  %v905_v47 = vld [vmem:[%s1099_s29 + $0x68] ss:$12 sps:$4 sm:$0xff]   ;;  %v906_v48 = vld [vmem:[%s1099_s29 + $0x60] ss:$12 sps:$4 sm:$0xff]  }
  0x36   : > { %824 = vmatpush3.bf16.msra.mxu1 %v893_v38  ;;  %v907_v49 = vld [vmem:[%s1099_s29 + $0x7c] ss:$12 sps:$4 sm:$0xff]   ;;  %v909_v50 = vld [vmem:[%s1099_s29 + $0x80] ss:$12 sps:$4 sm:$0xff]   ;;  %v910_v51 = vld [vmem:[%s1099_s29 + $0x78] ss:$12 sps:$4 sm:$0xff]  }
  0x37   : > { %454 = vmatpush1.bf16.msra.mxu0 %v894_v39  ;;  %825 = vmatprep.subr.bf16.mxu1 %v960_v32  ;;  %v911_v52 = vld [vmem:[%s1099_s29 + $0x94] ss:$12 sps:$4 sm:$0xff]   ;;  %v913_v53 = vld [vmem:[%s1099_s29 + $0x98] ss:$12 sps:$4 sm:$0xff]   ;;  %v914_v54 = vld [vmem:[%s1099_s29 + $0x90] ss:$12 sps:$4 sm:$0xff]  }
  0x38   : > { %455 = vmatprep.subr.bf16.mxu0 %v895_v40  ;;  %v915_v55 = vld [vmem:[%s1099_s29 + $0xac] ss:$12 sps:$4 sm:$0xff]   ;;  %v917_v56 = vld [vmem:[%s1099_s29 + $0xb0] ss:$12 sps:$4 sm:$0xff]   ;;  %v918_v57 = vld [vmem:[%s1099_s29 + $0xa8] ss:$12 sps:$4 sm:$0xff]  }
  0x39   : > { %s258_s5 = scalar_lea.vmem [#allocation4], %s843_s4  ;;  %s811_s6 = smul.u32 (%p1013_p6), 12, %s950_s11 }
  0x3a   : > { %826 = vmatpush3.bf16.msra.mxu1 %v897_v41 }
  0x3b   : > { %456 = vmatpush1.bf16.msra.mxu0 %v898_v42  ;;  %827 = vmatprep.subr.bf16.mxu1 %v960_v32  ;;  %s607_s9 = scalar_lea.vmem (%p1013_p6), %s1153_s2, %s811_s6 }
  0x3c   : > { %457 = vmatprep.subr.bf16.mxu0 %v899_v43 }
  0x3e   : > { %828 = vmatpush3.bf16.msra.mxu1 %v901_v44 }
  0x3f   : > { %458 = vmatpush1.bf16.msra.mxu0 %v902_v45  ;;  %829 = vmatprep.subr.bf16.mxu1 %v960_v32 }
  0x40   : > { %459 = vmatprep.subr.bf16.mxu0 %v903_v46 }
  0x42   : > { %830 = vmatpush3.bf16.msra.mxu1 %v905_v47 }
  0x43   : > { %460 = vmatpush1.bf16.msra.mxu0 %v906_v48  ;;  %831 = vmatprep.subr.bf16.mxu1 %v960_v32 }
  0x44   : > { %461 = vmatprep.subr.bf16.mxu0 %v907_v49 }
  0x46   : > { %832 = vmatpush3.bf16.msra.mxu1 %v909_v50 }
  0x47   : > { %462 = vmatpush1.bf16.msra.mxu0 %v910_v51  ;;  %833 = vmatprep.subr.bf16.mxu1 %v960_v32 }
  0x48   : > { %463 = vmatprep.subr.bf16.mxu0 %v911_v52 }
  0x4a   : > { %834 = vmatpush3.bf16.msra.mxu1 %v913_v53 }
  0x4b   : > { %464 = vmatpush1.bf16.msra.mxu0 %v914_v54  ;;  %835 = vmatprep.subr.bf16.mxu1 %v960_v32 }
  0x4c   : > { %465 = vmatprep.subr.bf16.mxu0 %v915_v55 }
  0x4e   : > { %836 = vmatpush3.bf16.msra.mxu1 %v917_v56 }
  0x4f   : > { %466 = vmatpush1.bf16.msra.mxu0 %v918_v57 }
  0x51   : > { %838 = vmatmul.mubr.bf16.vlgmr.msra.gmra.mrb[0].mxu1 %v919_v58 }
  0x52   : > { %484 = vmatmul.mubr.bf16.vlgmr.msra.gmra.mrb[0].mxu0 %v919_v58 }
 0x124   : > { %v528_v59 = vpop.f32.mrb[0].mxu1 }
 0x125   : > { %vm558_vm1 = vcmp.ge.f32.partialorder %v528_v59, 0.0  ;;  %v564_v60 = vmul.f32 0.2, %v528_v59  ;;  %v485_v61 = vpop.f32.mrb[0].mxu0  ;;  %v839_v62 = vpop.f32.mrb[1].mxu1 }
 0x126   : > { %vm556_vm2 = vcmp.ge.f32.partialorder %v485_v61, 0.0  ;;  %v562_v63 = vmul.f32 0.2, %v485_v61  ;;  %v487_v0 = vpop.f32.mrb[1].mxu0  ;;  %v531_v1 = vpop.f32.mrb[2].mxu1 }
 0x127   : > { %v570_v2 = vsel %vm558_vm1, %v528_v59, %v564_v60  ;;  %vm557_vm3 = vcmp.ge.f32.partialorder %v487_v0, 0.0  ;;  %v563_v3 = vmul.f32 0.2, %v487_v0  ;;  %vm561_vm4 = vcmp.ge.f32.partialorder %v531_v1, 0.0  ;;  %v489_v4 = vpop.f32.mrb[2].mxu0  ;;  %v840_v5 = vpop.f32.mrb[3].mxu1 }
 0x128   : > { %v808_v6 = vpack.c.bf16 %v570_v2, %v570_v2  ;;  %v568_v7 = vsel %vm556_vm2, %v485_v61, %v562_v63  ;;  %v567_v8 = vmul.f32 0.2, %v531_v1  ;;  %vm559_vm5 = vcmp.ge.f32.partialorder %v489_v4, 0.0  ;;  %v491_v9 = vpop.f32.mrb[3].mxu0  ;;  %604 = sbr.rel (!%p1013_p6) target bundleno = 311 (0x137), region = 66 }
 0x129   : > { %v569_v10 = vsel %vm557_vm3, %v487_v0, %v563_v3  ;;  %v565_v11 = vmul.f32 0.2, %v489_v4  ;;  %vm560_vm6 = vcmp.ge.f32.partialorder %v491_v9, 0.0  ;;  %v566_v12 = vmul.f32 0.2, %v491_v9 }
 0x12a   : > { %595 = vst [vmem:[%s258_s5 + $0x8] sm:$0xf] %v808_v6  ;;  %v807_v13 = vpack.c.bf16 %v569_v10, %v568_v7  ;;  %v573_v14 = vsel %vm561_vm4, %v531_v1, %v567_v8 }
 0x12b   : > { %v810_v15 = vpack.c.bf16 %v573_v14, %v573_v14  ;;  %v571_v16 = vsel %vm559_vm5, %v489_v4, %v565_v11  ;;  %v572_v17 = vsel %vm560_vm6, %v491_v9, %v566_v12 }
 0x12c   : > { %594 = vst [vmem:[%s258_s5] sm:$0xff] %v807_v13  ;;  %v809_v18 = vpack.c.bf16 %v572_v17, %v571_v16 }
 0x12d   : > { %597 = vst [vmem:[%s258_s5 + $0x14] sm:$0xf] %v810_v15 }
 0x12e   : > { %596 = vst [vmem:[%s258_s5 + $0xc] sm:$0xff] %v809_v18 }
 0x131   : > { %v800_v21 = vld [vmem:[%s258_s5 + $0x8] sm:$0xf] }
 0x132   : > { %801 = vst [vmem:[%s607_s9 + $0x8] sm:$0xf] %v800_v21 }
 0x133   : > { %v622_v19 = vld [vmem:[%s258_s5] sm:$0xff] }
 0x134   : > { %v802_v22 = vld [vmem:[%s258_s5 + $0x14] sm:$0xf]  ;;  %623 = vst [vmem:[%s607_s9] sm:$0xff] %v622_v19 }
 0x135   : > { %v624_v20 = vld [vmem:[%s258_s5 + $0xc] sm:$0xff]  ;;  %803 = vst [vmem:[%s607_s9 + $0x2c] sm:$0xf] %v802_v22 }
 0x136   : > { %625 = vst [vmem:[%s607_s9 + $0x24] sm:$0xff] %v624_v20 }
 0x137 PF: > { %s12_s13 = sadd.s32 1, %s958_s13   ;;  %s1155_s9 = smov %s946_s10 }
 0x138   : > { %p9_p11 = scmp.ge.s32.totalorder %s12_s13, 5   ;;  %s1156_s10 = smov %s1018_s19 }
 0x139   : > { %s1157_s11 = smov %s954_s12  ;;  %s1158_s12 = smov %s1160_s14 }
 0x13a   :  { %11 = sbr.rel (!%p9_p11) target bundleno = 3 (0x3), region = 138 }

// kernel: dcgan_d_nobn_forward.7
= control target key start
LH: loop header
LB: loop body
LE: loop exit
PB: predicated region body
PF: predicated region fallthrough
CT: control target
= control target key end

     0   :  { %vm18_vm0 = vcmask 261120   ;;  %v783_v52 = vmov 0.0   ;;  %vm604_vm2 = vcmask 257024   ;;  %s991_s1 = inlined_call_operand.vmem [shape: bf16[256,288], index: 1, kind: input, shape index: {}]   ;;  %s992_s0 = inlined_call_operand.vmem [shape: bf16[32,256], index: 0, kind: input, shape index: {}]   ;;  %s993_s2 = inlined_call_operand.vmem [shape: bf16[32,288], index: 2, kind: output, shape index: {}]  }
   0x1   :  { %v713_v0 = vld [vmem:[%s991_s1 + $0x4] ss:$12 sps:$4 sm:$0xff]   ;;  %v715_v1 = vld [vmem:[%s991_s1] ss:$12 sps:$4 sm:$0xff]   ;;  %v716_v2 = vld [vmem:[%s991_s1 + $0x1c] ss:$12 sps:$4 sm:$0xff]  }
   0x2   :  { %385 = vmatprep.subr.bf16.mxu0 %v713_v0  ;;  %v718_v3 = vld [vmem:[%s991_s1 + $0x18] ss:$12 sps:$4 sm:$0xff]   ;;  %v719_v4 = vld [vmem:[%s991_s1 + $0x34] ss:$12 sps:$4 sm:$0xff]   ;;  %v721_v5 = vld [vmem:[%s991_s1 + $0x30] ss:$12 sps:$4 sm:$0xff]  }
   0x3   :  { %386 = vmatpush1.bf16.msra.mxu0 %v715_v1  ;;  %v722_v6 = vld [vmem:[%s991_s1 + $0x4c] ss:$12 sps:$4 sm:$0xff]   ;;  %v724_v7 = vld [vmem:[%s991_s1 + $0x48] ss:$12 sps:$4 sm:$0xff]   ;;  %v725_v10 = vld [vmem:[%s991_s1 + $0x64] ss:$12 sps:$4 sm:$0xff]  }
   0x4   :  { %387 = vmatprep.subr.bf16.mxu0 %v716_v2  ;;  %v734_v8 = vld [vmem:[%s991_s1 + $0xc8] ss:$12 sps:$4 sm:$0xff]   ;;  %v739_v11 = vld [vmem:[%s991_s1 + $0xe0] ss:$12 sps:$4 sm:$0xff]   ;;  %v744_v15 = vld [vmem:[%s991_s1 + $0xf8] ss:$12 sps:$4 sm:$0xff]  }
   0x5   :  { %v735_v9 = vld [vmem:[%s991_s1 + $0x8] ss:$12 sps:$4 sm:$0xff]   ;;  %684 = vmatprep.subr.bf16.mxu1 %v734_v8  ;;  %v740_v12 = vld [vmem:[%s991_s1 + $0x20] ss:$12 sps:$4 sm:$0xff]   ;;  %v745_v16 = vld [vmem:[%s991_s1 + $0x38] ss:$12 sps:$4 sm:$0xff]  }
   0x6   :  { %685 = vmatpush3.bf16.msra.mxu1 %v735_v9  ;;  %v727_v13 = vld [vmem:[%s991_s1 + $0x60] ss:$12 sps:$4 sm:$0xff]   ;;  %v728_v14 = vld [vmem:[%s991_s1 + $0x7c] ss:$12 sps:$4 sm:$0xff]   ;;  %v730_v17 = vld [vmem:[%s991_s1 + $0x78] ss:$12 sps:$4 sm:$0xff]  }
   0x7   :  { %388 = vmatpush1.bf16.msra.mxu0 %v718_v3  ;;  %686 = vmatprep.subr.bf16.mxu1 %v739_v11  ;;  %v731_v18 = vld [vmem:[%s991_s1 + $0x94] ss:$12 sps:$4 sm:$0xff]   ;;  %v749_v19 = vld [vmem:[%s991_s1 + $0x110] ss:$12 sps:$4 sm:$0xff]   ;;  %v736_v23 = vld [vmem:[%s991_s1 + $0xac] ss:$12 sps:$4 sm:$0xff]  }
   0x8   :  { %389 = vmatprep.subr.bf16.mxu0 %v719_v4  ;;  %v750_v20 = vld [vmem:[%s991_s1 + $0x50] ss:$12 sps:$4 sm:$0xff]   ;;  %v754_v22 = vld [vmem:[%s991_s1 + $0x128] ss:$12 sps:$4 sm:$0xff]   ;;  %v759_v25 = vld [vmem:[%s991_s1 + $0x140] ss:$12 sps:$4 sm:$0xff]  }
   0x9   :  { %v733_v21 = vld [vmem:[%s991_s1 + $0x90] ss:$12 sps:$4 sm:$0xff]   ;;  %v755_v24 = vld [vmem:[%s991_s1 + $0x68] ss:$12 sps:$4 sm:$0xff]   ;;  %v760_v28 = vld [vmem:[%s991_s1 + $0x80] ss:$12 sps:$4 sm:$0xff]  }
   0xa   :  { %687 = vmatpush3.bf16.msra.mxu1 %v740_v12  ;;  %v738_v26 = vld [vmem:[%s991_s1 + $0xa8] ss:$12 sps:$4 sm:$0xff]   ;;  %v741_v27 = vld [vmem:[%s991_s1 + $0xc4] ss:$12 sps:$4 sm:$0xff]   ;;  %v743_v30 = vld [vmem:[%s991_s1 + $0xc0] ss:$12 sps:$4 sm:$0xff]  }
   0xb   :  { %390 = vmatpush1.bf16.msra.mxu0 %v721_v5  ;;  %688 = vmatprep.subr.bf16.mxu1 %v744_v15  ;;  %v764_v29 = vld [vmem:[%s991_s1 + $0x158] ss:$12 sps:$4 sm:$0xff]   ;;  %v746_v31 = vld [vmem:[%s991_s1 + $0xdc] ss:$12 sps:$4 sm:$0xff]   ;;  %v751_v35 = vld [vmem:[%s991_s1 + $0xf4] ss:$12 sps:$4 sm:$0xff]  }
   0xc   :  { %391 = vmatprep.subr.bf16.mxu0 %v722_v6  ;;  %v765_v32 = vld [vmem:[%s991_s1 + $0x98] ss:$12 sps:$4 sm:$0xff]   ;;  %v769_v33 = vld [vmem:[%s991_s1 + $0x170] ss:$12 sps:$4 sm:$0xff]   ;;  %v773_v40 = vld [vmem:[%s992_s0] ss:$8 sps:$4 sm:$0xff]  }
   0xd   :  { %v748_v34 = vld [vmem:[%s991_s1 + $0xd8] ss:$12 sps:$4 sm:$0xff]   ;;  %v770_v37 = vld [vmem:[%s991_s1 + $0xb0] ss:$12 sps:$4 sm:$0xff]   ;;  %v758_v42 = vld [vmem:[%s991_s1 + $0x108] ss:$12 sps:$4 sm:$0xff]  }
   0xe   :  { %689 = vmatpush3.bf16.msra.mxu1 %v745_v16  ;;  %v775_v36 = vld [vmem:[%s992_s0 + $0x4] ss:$8 sps:$4 sm:$0xff]   ;;  %v753_v38 = vld [vmem:[%s991_s1 + $0xf0] ss:$12 sps:$4 sm:$0xff]   ;;  %v771_v48 = vld [vmem:[%s991_s1 + $0x154] ss:$12 sps:$4 sm:$0xff]  }
   0xf   :  { %392 = vmatpush1.bf16.msra.mxu0 %v724_v7  ;;  %690 = vmatprep.subr.bf16.mxu1 %v749_v19  ;;  %v756_v39 = vld [vmem:[%s991_s1 + $0x10c] ss:$12 sps:$4 sm:$0xff]   ;;  %v780_v41 = vld [vmem:[%s992_s0 + $0x14] ss:$8 sps:$4 sm:$0xff]   ;;  %v761_v43 = vld [vmem:[%s991_s1 + $0x124] ss:$12 sps:$4 sm:$0xff]  }
  0x10   :  { %393 = vmatprep.subr.bf16.mxu0 %v725_v10  ;;  %470 = vmatprep.mubr.bf16.mxu1 %v775_v36  ;;  %v763_v44 = vld [vmem:[%s991_s1 + $0x120] ss:$12 sps:$4 sm:$0xff]   ;;  %v766_v45 = vld [vmem:[%s991_s1 + $0x13c] ss:$12 sps:$4 sm:$0xff]   ;;  %v782_v46 = vld [vmem:[%s992_s0 + $0x10] ss:$8 sps:$4 sm:$0xff]  }
  0x11   :  { %417 = vmatprep.mubr.bf16.mxu0 %v775_v36  ;;  %v768_v47 = vld [vmem:[%s991_s1 + $0x138] ss:$12 sps:$4 sm:$0xff]   ;;  %v776_v49 = vld [vmem:[%s991_s1 + $0x150] ss:$12 sps:$4 sm:$0xff]   ;;  %v779_v51 = vld [vmem:[%s991_s1 + $0x168] ss:$12 sps:$4 sm:$0xff]  }
  0x12   :  { %691 = vmatpush3.bf16.msra.mxu1 %v750_v20  ;;  %v777_v50 = vld [vmem:[%s991_s1 + $0x16c] ss:$12 sps:$4 sm:$0xff]   ;;  %19 = vst.msk [vmem:[#allocation2 + $0x10] sm:$0xff] %vm18_vm0, %v783_v52  ;;  %22 = vst.msk [vmem:[#allocation2 + $0x28] sm:$0xff] %vm18_vm0, %v783_v52 }
  0x13   :  { %394 = vmatpush1.bf16.msra.mxu0 %v727_v13  ;;  %692 = vmatprep.subr.bf16.mxu1 %v754_v22  ;;  %25 = vst.msk [vmem:[#allocation2 + $0x40] sm:$0xff] %vm18_vm0, %v783_v52  ;;  %28 = vst.msk [vmem:[#allocation2 + $0x58] sm:$0xff] %vm18_vm0, %v783_v52 }
  0x14   :  { %395 = vmatprep.subr.bf16.mxu0 %v728_v14 }
  0x16   :  { %693 = vmatpush3.bf16.msra.mxu1 %v755_v24 }
  0x17   :  { %396 = vmatpush1.bf16.msra.mxu0 %v730_v17  ;;  %694 = vmatprep.subr.bf16.mxu1 %v759_v25 }
  0x18   :  { %397 = vmatprep.subr.bf16.mxu0 %v731_v18 }
  0x19   :  { %v31_v54 = vld [vmem:[#allocation2 + $0x10] sm:$0xff]  ;;  %v34_v58 = vld [vmem:[#allocation2 + $0x28] sm:$0xff] }
  0x1a   :  { %695 = vmatpush3.bf16.msra.mxu1 %v760_v28  ;;  %v37_v0 = vld [vmem:[#allocation2 + $0x40] sm:$0xff]  ;;  %v40_v4 = vld [vmem:[#allocation2 + $0x58] sm:$0xff] }
  0x1b   :  { %398 = vmatpush1.bf16.msra.mxu0 %v733_v21  ;;  %696 = vmatprep.subr.bf16.mxu1 %v764_v29 }
  0x1c   :  { %399 = vmatprep.subr.bf16.mxu0 %v736_v23 }
  0x1e   :  { %697 = vmatpush3.bf16.msra.mxu1 %v765_v32 }
  0x1f   :  { %400 = vmatpush1.bf16.msra.mxu0 %v738_v26  ;;  %698 = vmatprep.subr.bf16.mxu1 %v769_v33 }
  0x20   :  { %401 = vmatprep.subr.bf16.mxu0 %v741_v27 }
  0x22   :  { %699 = vmatpush3.bf16.msra.mxu1 %v770_v37 }
  0x23   :  { %402 = vmatpush1.bf16.msra.mxu0 %v743_v30 }
  0x24   :  { %403 = vmatprep.subr.bf16.mxu0 %v746_v31 }
  0x25   :  { %471 = vmatmul.mubr.bf16.vlgmr.msra.gmra.mrb[0].mxu1 %v773_v40 }
  0x26   :  { %478 = vmatprep.mubr.bf16.mxu1 %v780_v41 }
  0x27   :  { %404 = vmatpush1.bf16.msra.mxu0 %v748_v34 }
  0x28   :  { %405 = vmatprep.subr.bf16.mxu0 %v751_v35 }
  0x2b   :  { %406 = vmatpush1.bf16.msra.mxu0 %v753_v38 }
  0x2c   :  { %407 = vmatprep.subr.bf16.mxu0 %v756_v39 }
  0x2d   :  { %479 = vmatmul.mubr.bf16.gmra.mrb[4].mxu1 %v782_v46 }
  0x2f   :  { %408 = vmatpush1.bf16.msra.mxu0 %v758_v42 }
  0x30   :  { %409 = vmatprep.subr.bf16.mxu0 %v761_v43 }
  0x33   :  { %410 = vmatpush1.bf16.msra.mxu0 %v763_v44 }
  0x34   :  { %411 = vmatprep.subr.bf16.mxu0 %v766_v45 }
  0x37   :  { %412 = vmatpush1.bf16.msra.mxu0 %v768_v47 }
  0x38   :  { %413 = vmatprep.subr.bf16.mxu0 %v771_v48 }
  0x3b   :  { %414 = vmatpush1.bf16.msra.mxu0 %v776_v49 }
  0x3c   :  { %415 = vmatprep.subr.bf16.mxu0 %v777_v50 }
  0x3f   :  { %416 = vmatpush1.bf16.msra.mxu0 %v779_v51 }
  0x42   :  { %418 = vmatmul.mubr.bf16.vlgmr.msra.gmra.mrb[0].mxu0 %v773_v40 }
  0x43   :  { %427 = vmatprep.mubr.bf16.mxu0 %v780_v41 }
  0x4a   :  { %428 = vmatmul.mubr.bf16.gmra.mrb[4].mxu0 %v782_v46 }
  0xf8   :  { %v700_v53 = vpop.f32.mrb[0].mxu1 }
  0xf9   :  { %v701_v55 = vpop.f32.mrb[1].mxu1 }
  0xfa   :  { %v702_v56 = vadd.f32 %v701_v55, %v700_v53  ;;  %v703_v57 = vpop.f32.mrb[2].mxu1 }
  0xfb   :  { %v704_v59 = vpop.f32.mrb[3].mxu1 }
  0xfc   :  { %v489_v60 = vadd.f32 %v702_v56, %v31_v54  ;;  %v705_v61 = vadd.f32 %v704_v59, %v703_v57 }
  0xfe   :  { %502 = vst.msk [vmem:[#allocation2 + $0x10] sm:$0xff] %vm18_vm0, %v489_v60  ;;  %v492_v62 = vadd.f32 %v705_v61, %v34_v58 }
 0x100   :  { %505 = vst.msk [vmem:[#allocation2 + $0x28] sm:$0xff] %vm18_vm0, %v492_v62  ;;  %v706_v63 = vpop.f32.mrb[4].mxu1 }
 0x101   :  { %v707_v1 = vpop.f32.mrb[5].mxu1 }
 0x102   :  { %v708_v2 = vadd.f32 %v707_v1, %v706_v63  ;;  %v709_v3 = vpop.f32.mrb[6].mxu1 }
 0x103   :  { %v710_v5 = vpop.f32.mrb[7].mxu1 }
 0x104   :  { %v495_v6 = vadd.f32 %v708_v2, %v37_v0  ;;  %v711_v7 = vadd.f32 %v710_v5, %v709_v3 }
 0x105   :  { %v517_v8 = vld [vmem:[#allocation2 + $0x10] sm:$0xff] }
 0x106   :  { %vm529_vm1 = vcmp.ge.f32.partialorder %v517_v8, 0.0  ;;  %v541_v9 = vmul.f32 0.2, %v517_v8  ;;  %508 = vst.msk [vmem:[#allocation2 + $0x40] sm:$0xff] %vm18_vm0, %v495_v6  ;;  %v498_v10 = vadd.f32 %v711_v7, %v40_v4 }
 0x107   :  { %v520_v11 = vld [vmem:[#allocation2 + $0x28] sm:$0xff] }
 0x108   :  { %v553_v12 = vsel %vm529_vm1, %v517_v8, %v541_v9  ;;  %vm532_vm3 = vcmp.ge.f32.partialorder %v520_v11, 0.0  ;;  %v544_v13 = vmul.f32 0.2, %v520_v11  ;;  %511 = vst.msk [vmem:[#allocation2 + $0x58] sm:$0xff] %vm18_vm0, %v498_v10 }
 0x109   :  { %v677_v14 = vpack.c.bf16 %v553_v12, %v553_v12 }
 0x10a   :  { %v556_v15 = vsel %vm532_vm3, %v520_v11, %v544_v13 }
 0x10b   :  { %605 = vst.msk [vmem:[%s993_s2 + $0x8] sm:$0xf] %vm604_vm2, %v677_v14  ;;  %v679_v16 = vpack.c.bf16 %v556_v15, %v556_v15 }
 0x10d   :  { %607 = vst.msk [vmem:[%s993_s2 + $0x14] sm:$0xf] %vm604_vm2, %v679_v16  ;;  %v523_v17 = vld [vmem:[#allocation2 + $0x40] sm:$0xff] }
 0x10e   :  { %vm535_vm4 = vcmp.ge.f32.partialorder %v523_v17, 0.0  ;;  %v547_v19 = vmul.f32 0.2, %v523_v17 }
 0x10f   :  { %v526_v21 = vld [vmem:[#allocation2 + $0x58] sm:$0xff] }
 0x110   :  { %v559_v23 = vsel %vm535_vm4, %v523_v17, %v547_v19  ;;  %vm538_vm5 = vcmp.ge.f32.partialorder %v526_v21, 0.0  ;;  %v550_v24 = vmul.f32 0.2, %v526_v21 }
 0x111   :  { %v681_v26 = vpack.c.bf16 %v559_v23, %v559_v23 }
 0x112   :  { %v562_v29 = vsel %vm538_vm5, %v526_v21, %v550_v24 }
 0x113   :  { %609 = vst.msk [vmem:[%s993_s2 + $0x20] sm:$0xf] %vm604_vm2, %v681_v26  ;;  %v683_v32 = vpack.c.bf16 %v562_v29, %v562_v29 }
 0x115   :  { %v419_v18 = vpop.f32.mrb[0].mxu0  ;;  %611 = vst.msk [vmem:[%s993_s2 + $0x2c] sm:$0xf] %vm604_vm2, %v683_v32 }
 0x116   :  { %v421_v20 = vpop.f32.mrb[1].mxu0  ;;  %vm527_vm6 = vcmp.ge.f32.partialorder %v419_v18, 0.0  ;;  %v539_v25 = vmul.f32 0.2, %v419_v18 }
 0x117   :  { %v423_v22 = vpop.f32.mrb[2].mxu0  ;;  %vm528_vm7 = vcmp.ge.f32.partialorder %v421_v20, 0.0  ;;  %v540_v28 = vmul.f32 0.2, %v421_v20 }
 0x118   :  { %v425_v27 = vpop.f32.mrb[3].mxu0  ;;  %v551_v30 = vsel %vm527_vm6, %v419_v18, %v539_v25  ;;  %vm530_vm8 = vcmp.ge.f32.partialorder %v423_v22, 0.0  ;;  %v542_v31 = vmul.f32 0.2, %v423_v22 }
 0x119   :  { %v552_v33 = vsel %vm528_vm7, %v421_v20, %v540_v28  ;;  %vm531_vm9 = vcmp.ge.f32.partialorder %v425_v27, 0.0  ;;  %v543_v34 = vmul.f32 0.2, %v425_v27 }
 0x11a   :  { %v676_v35 = vpack.c.bf16 %v552_v33, %v551_v30  ;;  %v554_v36 = vsel %vm530_vm8, %v423_v22, %v542_v31 }
 0x11b   :  { %v555_v37 = vsel %vm531_vm9, %v425_v27, %v543_v34 }
 0x11c   :  { %603 = vst [vmem:[%s993_s2] sm:$0xff] %v676_v35  ;;  %v678_v39 = vpack.c.bf16 %v555_v37, %v554_v36 }
 0x11d   :  { %v429_v38 = vpop.f32.mrb[4].mxu0 }
 0x11e   :  { %v431_v40 = vpop.f32.mrb[5].mxu0  ;;  %606 = vst [vmem:[%s993_s2 + $0xc] sm:$0xff] %v678_v39  ;;  %vm533_vm10 = vcmp.ge.f32.partialorder %v429_v38, 0.0  ;;  %v545_v42 = vmul.f32 0.2, %v429_v38 }
 0x11f   :  { %v433_v41 = vpop.f32.mrb[6].mxu0  ;;  %vm534_vm11 = vcmp.ge.f32.partialorder %v431_v40, 0.0  ;;  %v546_v44 = vmul.f32 0.2, %v431_v40 }
 0x120   :  { %v435_v43 = vpop.f32.mrb[7].mxu0  ;;  %v557_v45 = vsel %vm533_vm10, %v429_v38, %v545_v42  ;;  %vm536_vm12 = vcmp.ge.f32.partialorder %v433_v41, 0.0  ;;  %v548_v46 = vmul.f32 0.2, %v433_v41 }
 0x121   :  { %v558_v47 = vsel %vm534_vm11, %v431_v40, %v546_v44  ;;  %vm537_vm13 = vcmp.ge.f32.partialorder %v435_v43, 0.0  ;;  %v549_v48 = vmul.f32 0.2, %v435_v43 }
 0x122   :  { %v680_v49 = vpack.c.bf16 %v558_v47, %v557_v45  ;;  %v560_v50 = vsel %vm536_vm12, %v433_v41, %v548_v46 }
 0x123   :  { %v561_v51 = vsel %vm537_vm13, %v435_v43, %v549_v48 }
 0x124   :  { %608 = vst [vmem:[%s993_s2 + $0x18] sm:$0xff] %v680_v49  ;;  %v682_v52 = vpack.c.bf16 %v561_v51, %v560_v50 }
 0x126   :  { %610 = vst [vmem:[%s993_s2 + $0x24] sm:$0xff] %v682_v52 }

// kernel: dcgan_d_nobn_forward.8
= control target key start
LH: loop header
LB: loop body
LE: loop exit
PB: predicated region body
PF: predicated region fallthrough
CT: control target
= control target key end

     0   :  { %vm16_vm0 = vcmask 588800   ;;  %v813_v48 = vmov 0.0   ;;  %vm599_vm2 = vcmask 584704   ;;  %s1021_s1 = inlined_call_operand.vmem [shape: bf16[512,72], index: 1, kind: input, shape index: {}]   ;;  %s1022_s0 = inlined_call_operand.vmem [shape: bf16[64,512], index: 0, kind: input, shape index: {}]   ;;  %s1023_s2 = inlined_call_operand.vmem [shape: bf16[64,72], index: 2, kind: output, shape index: {}]  }
   0x1   :  { %v757_v0 = vld [vmem:[%s1021_s1 + $0x40] sm:$0xff]   ;;  %v761_v4 = vld [vmem:[%s1021_s1 + $0x48] sm:$0xff]   ;;  %v765_v8 = vld [vmem:[%s1021_s1 + $0x50] sm:$0xff]   ;;  %17 = vst.msk [vmem:[#allocation2] sm:$0xff] %vm16_vm0, %v813_v48 }
   0x2   :  { %v758_v1 = vld [vmem:[%s1021_s1 + $0xc0] sm:$0xff]   ;;  %676 = vmatprep.subr.bf16.mxu0 %v757_v0  ;;  %v762_v5 = vld [vmem:[%s1021_s1 + $0xc8] sm:$0xff]   ;;  %v766_v9 = vld [vmem:[%s1021_s1 + $0xd0] sm:$0xff]   ;;  %18 = vst.msk [vmem:[#allocation2 + $0x8] sm:$0xff] %vm16_vm0, %v813_v48 }
   0x3   :  { %v759_v2 = vld [vmem:[%s1021_s1] sm:$0xff]   ;;  %716 = vmatprep.subr.bf16.mxu1 %v758_v1  ;;  %v763_v6 = vld [vmem:[%s1021_s1 + $0x8] sm:$0xff]   ;;  %v767_v10 = vld [vmem:[%s1021_s1 + $0x10] sm:$0xff]   ;;  %19 = vst.msk [vmem:[#allocation2 + $0x10] sm:$0xff] %vm16_vm0, %v813_v48 }
   0x4   :  { %v760_v3 = vld [vmem:[%s1021_s1 + $0x80] sm:$0xff]   ;;  %677 = vmatpush3.bf16.msra.mxu0 %v759_v2  ;;  %v764_v7 = vld [vmem:[%s1021_s1 + $0x88] sm:$0xff]   ;;  %v768_v11 = vld [vmem:[%s1021_s1 + $0x90] sm:$0xff]   ;;  %20 = vst.msk [vmem:[#allocation2 + $0x18] sm:$0xff] %vm16_vm0, %v813_v48 }
   0x5   :  { %717 = vmatpush3.bf16.msra.mxu1 %v760_v3  ;;  %678 = vmatprep.subr.bf16.mxu0 %v761_v4  ;;  %v769_v12 = vld [vmem:[%s1021_s1 + $0x58] sm:$0xff]   ;;  %v773_v16 = vld [vmem:[%s1021_s1 + $0x60] sm:$0xff]   ;;  %v777_v20 = vld [vmem:[%s1021_s1 + $0x68] sm:$0xff]   ;;  %21 = vst.msk [vmem:[#allocation2 + $0x20] sm:$0xff] %vm16_vm0, %v813_v48 }
   0x6   :  { %718 = vmatprep.subr.bf16.mxu1 %v762_v5  ;;  %v770_v13 = vld [vmem:[%s1021_s1 + $0xd8] sm:$0xff]   ;;  %v774_v17 = vld [vmem:[%s1021_s1 + $0xe0] sm:$0xff]   ;;  %v778_v21 = vld [vmem:[%s1021_s1 + $0xe8] sm:$0xff]   ;;  %22 = vst.msk [vmem:[#allocation2 + $0x28] sm:$0xff] %vm16_vm0, %v813_v48 }
   0x7   :  { %v771_v14 = vld [vmem:[%s1021_s1 + $0x18] sm:$0xff]   ;;  %v775_v18 = vld [vmem:[%s1021_s1 + $0x20] sm:$0xff]   ;;  %v779_v22 = vld [vmem:[%s1021_s1 + $0x28] sm:$0xff]   ;;  %23 = vst.msk [vmem:[#allocation2 + $0x30] sm:$0xff] %vm16_vm0, %v813_v48 }
   0x8   :  { %679 = vmatpush3.bf16.msra.mxu0 %v763_v6  ;;  %v772_v15 = vld [vmem:[%s1021_s1 + $0x98] sm:$0xff]   ;;  %v776_v19 = vld [vmem:[%s1021_s1 + $0xa0] sm:$0xff]   ;;  %v780_v23 = vld [vmem:[%s1021_s1 + $0xa8] sm:$0xff]   ;;  %24 = vst.msk [vmem:[#allocation2 + $0x38] sm:$0xff] %vm16_vm0, %v813_v48 }
   0x9   :  { %719 = vmatpush3.bf16.msra.mxu1 %v764_v7  ;;  %680 = vmatprep.subr.bf16.mxu0 %v765_v8  ;;  %v781_v24 = vld [vmem:[%s1021_s1 + $0x70] sm:$0xff]   ;;  %v785_v28 = vld [vmem:[%s1021_s1 + $0x78] sm:$0xff]   ;;  %v25_v58 = vld [vmem:[#allocation2] sm:$0xff] }
   0xa   :  { %720 = vmatprep.subr.bf16.mxu1 %v766_v9  ;;  %v782_v25 = vld [vmem:[%s1021_s1 + $0xf0] sm:$0xff]   ;;  %v786_v29 = vld [vmem:[%s1021_s1 + $0xf8] sm:$0xff]   ;;  %v26_v63 = vld [vmem:[#allocation2 + $0x8] sm:$0xff] }
   0xb   :  { %v783_v26 = vld [vmem:[%s1021_s1 + $0x30] sm:$0xff]   ;;  %v787_v30 = vld [vmem:[%s1021_s1 + $0x38] sm:$0xff]  }
   0xc   :  { %681 = vmatpush3.bf16.msra.mxu0 %v767_v10  ;;  %v784_v27 = vld [vmem:[%s1021_s1 + $0xb0] sm:$0xff]   ;;  %v788_v31 = vld [vmem:[%s1021_s1 + $0xb8] sm:$0xff]  }
   0xd   :  { %721 = vmatpush3.bf16.msra.mxu1 %v768_v11  ;;  %682 = vmatprep.subr.bf16.mxu0 %v769_v12  ;;  %v789_v32 = vld [vmem:[%s1022_s0] ss:$16 sps:$4 sm:$0xff]   ;;  %v791_v33 = vld [vmem:[%s1022_s0 + $0x4] ss:$16 sps:$4 sm:$0xff]   ;;  %v792_v34 = vld [vmem:[%s1022_s0 + $0x8] ss:$16 sps:$4 sm:$0xff]  }
   0xe   :  { %722 = vmatprep.subr.bf16.mxu1 %v770_v13  ;;  %v794_v35 = vld [vmem:[%s1022_s0 + $0xc] ss:$16 sps:$4 sm:$0xff]   ;;  %417 = vmatprep.mubr.bf16.mxu0 %v791_v33  ;;  %v795_v36 = vld [vmem:[%s1022_s0 + $0x24] ss:$16 sps:$4 sm:$0xff]   ;;  %v799_v38 = vld [vmem:[%s1022_s0 + $0x20] ss:$16 sps:$4 sm:$0xff]  }
   0xf   :  { %482 = vmatprep.mubr.bf16.mxu1 %v794_v35  ;;  %v797_v37 = vld [vmem:[%s1022_s0 + $0x2c] ss:$16 sps:$4 sm:$0xff]   ;;  %v800_v39 = vld [vmem:[%s1022_s0 + $0x28] ss:$16 sps:$4 sm:$0xff]   ;;  %v801_v40 = vld [vmem:[%s1022_s0 + $0x44] ss:$16 sps:$4 sm:$0xff]  }
  0x10   :  { %683 = vmatpush3.bf16.msra.mxu0 %v771_v14  ;;  %v803_v41 = vld [vmem:[%s1022_s0 + $0x4c] ss:$16 sps:$4 sm:$0xff]   ;;  %v805_v42 = vld [vmem:[%s1022_s0 + $0x40] ss:$16 sps:$4 sm:$0xff]   ;;  %v806_v43 = vld [vmem:[%s1022_s0 + $0x48] ss:$16 sps:$4 sm:$0xff]  }
  0x11   :  { %723 = vmatpush3.bf16.msra.mxu1 %v772_v15  ;;  %684 = vmatprep.subr.bf16.mxu0 %v773_v16  ;;  %v807_v44 = vld [vmem:[%s1022_s0 + $0x64] ss:$16 sps:$4 sm:$0xff]   ;;  %v809_v45 = vld [vmem:[%s1022_s0 + $0x6c] ss:$16 sps:$4 sm:$0xff]   ;;  %v811_v46 = vld [vmem:[%s1022_s0 + $0x60] ss:$16 sps:$4 sm:$0xff]  }
  0x12   :  { %724 = vmatprep.subr.bf16.mxu1 %v774_v17  ;;  %v812_v47 = vld [vmem:[%s1022_s0 + $0x68] ss:$16 sps:$4 sm:$0xff]   ;;  %v27_v12 = vld [vmem:[#allocation2 + $0x10] sm:$0xff] }
  0x13   :  { %v28_v17 = vld [vmem:[#allocation2 + $0x18] sm:$0xff] }
  0x14   :  { %685 = vmatpush3.bf16.msra.mxu0 %v775_v18 }
  0x15   :  { %725 = vmatpush3.bf16.msra.mxu1 %v776_v19  ;;  %686 = vmatprep.subr.bf16.mxu0 %v777_v20 }
  0x16   :  { %726 = vmatprep.subr.bf16.mxu1 %v778_v21 }
  0x18   :  { %687 = vmatpush3.bf16.msra.mxu0 %v779_v22 }
  0x19   :  { %727 = vmatpush3.bf16.msra.mxu1 %v780_v23  ;;  %688 = vmatprep.subr.bf16.mxu0 %v781_v24 }
  0x1a   :  { %728 = vmatprep.subr.bf16.mxu1 %v782_v25 }
  0x1c   :  { %689 = vmatpush3.bf16.msra.mxu0 %v783_v26 }
  0x1d   :  { %729 = vmatpush3.bf16.msra.mxu1 %v784_v27  ;;  %690 = vmatprep.subr.bf16.mxu0 %v785_v28 }
  0x1e   :  { %730 = vmatprep.subr.bf16.mxu1 %v786_v29 }
  0x20   :  { %691 = vmatpush3.bf16.msra.mxu0 %v787_v30 }
  0x21   :  { %731 = vmatpush3.bf16.msra.mxu1 %v788_v31 }
  0x23   :  { %418 = vmatmul.mubr.bf16.vlgmr.msra.gmra.mrb[0].mxu0 %v789_v32 }
  0x24   :  { %483 = vmatmul.mubr.bf16.vlgmr.msra.gmra.mrb[0].mxu1 %v792_v34  ;;  %425 = vmatprep.mubr.bf16.mxu0 %v795_v36  ;;  %v29_v36 = vld [vmem:[#allocation2 + $0x20] sm:$0xff] }
  0x25   :  { %490 = vmatprep.mubr.bf16.mxu1 %v797_v37 }
  0x2b   :  { %426 = vmatmul.mubr.bf16.gmra.mrb[4].mxu0 %v799_v38 }
  0x2c   :  { %491 = vmatmul.mubr.bf16.gmra.mrb[4].mxu1 %v800_v39  ;;  %433 = vmatprep.mubr.bf16.mxu0 %v801_v40 }
  0x2d   :  { %498 = vmatprep.mubr.bf16.mxu1 %v803_v41 }
  0x33   :  { %434 = vmatmul.mubr.bf16.gmra.mrb[8].mxu0 %v805_v42 }
  0x34   :  { %499 = vmatmul.mubr.bf16.gmra.mrb[8].mxu1 %v806_v43  ;;  %441 = vmatprep.mubr.bf16.mxu0 %v807_v44  ;;  %v30_v43 = vld [vmem:[#allocation2 + $0x28] sm:$0xff] }
  0x35   :  { %506 = vmatprep.mubr.bf16.mxu1 %v809_v45 }
  0x3b   :  { %442 = vmatmul.mubr.bf16.gmra.mrb[12].mxu0 %v811_v46 }
  0x3c   :  { %507 = vmatmul.mubr.bf16.gmra.mrb[12].mxu1 %v812_v47 }
  0xf6   :  { %v692_v49 = vpop.f32.mrb[0].mxu0 }
  0xf7   :  { %v732_v50 = vpop.f32.mrb[0].mxu1  ;;  %v693_v51 = vpop.f32.mrb[1].mxu0 }
  0xf8   :  { %v694_v52 = vadd.f32 %v693_v51, %v692_v49  ;;  %v733_v53 = vpop.f32.mrb[1].mxu1  ;;  %v695_v54 = vpop.f32.mrb[2].mxu0 }
  0xf9   :  { %v734_v55 = vadd.f32 %v733_v53, %v732_v50  ;;  %v735_v56 = vpop.f32.mrb[2].mxu1  ;;  %v696_v57 = vpop.f32.mrb[3].mxu0 }
  0xfa   :  { %v697_v59 = vadd.f32 %v696_v57, %v695_v54  ;;  %v736_v60 = vpop.f32.mrb[3].mxu1 }
  0xfb   :  { %v485_v61 = vadd.f32 %v734_v55, %v694_v52  ;;  %v737_v62 = vadd.f32 %v736_v60, %v735_v56 }
  0xfd   :  { %v515_v0 = vadd.f32 %v485_v61, %v25_v58  ;;  %v488_v1 = vadd.f32 %v737_v62, %v697_v59  ;;  %v31_v62 = vld [vmem:[#allocation2 + $0x30] sm:$0xff] }
  0xfe   :  { %v698_v2 = vpop.f32.mrb[4].mxu0 }
  0xff   :  { %524 = vst.msk [vmem:[#allocation2] sm:$0xff] %vm16_vm0, %v515_v0  ;;  %v516_v3 = vadd.f32 %v488_v1, %v26_v63  ;;  %v738_v4 = vpop.f32.mrb[4].mxu1  ;;  %v699_v5 = vpop.f32.mrb[5].mxu0 }
 0x100   :  { %v700_v6 = vadd.f32 %v699_v5, %v698_v2  ;;  %v739_v7 = vpop.f32.mrb[5].mxu1  ;;  %v701_v8 = vpop.f32.mrb[6].mxu0  ;;  %v32_v5 = vld [vmem:[#allocation2 + $0x38] sm:$0xff] }
 0x101   :  { %525 = vst.msk [vmem:[#allocation2 + $0x8] sm:$0xff] %vm16_vm0, %v516_v3  ;;  %v740_v9 = vadd.f32 %v739_v7, %v738_v4  ;;  %v741_v10 = vpop.f32.mrb[6].mxu1  ;;  %v702_v11 = vpop.f32.mrb[7].mxu0 }
 0x102   :  { %v703_v13 = vadd.f32 %v702_v11, %v701_v8  ;;  %v742_v14 = vpop.f32.mrb[7].mxu1 }
 0x103   :  { %v493_v15 = vadd.f32 %v740_v9, %v700_v6  ;;  %v743_v16 = vadd.f32 %v742_v14, %v741_v10 }
 0x105   :  { %v517_v18 = vadd.f32 %v493_v15, %v27_v12  ;;  %v496_v19 = vadd.f32 %v743_v16, %v703_v13 }
 0x106   :  { %v535_v20 = vld [vmem:[#allocation2] sm:$0xff]  ;;  %v704_v21 = vpop.f32.mrb[8].mxu0 }
 0x107   :  { %vm543_vm1 = vcmp.ge.f32.partialorder %v535_v20, 0.0  ;;  %v551_v22 = vmul.f32 0.2, %v535_v20  ;;  %526 = vst.msk [vmem:[#allocation2 + $0x10] sm:$0xff] %vm16_vm0, %v517_v18  ;;  %v518_v23 = vadd.f32 %v496_v19, %v28_v17  ;;  %v744_v24 = vpop.f32.mrb[8].mxu1  ;;  %v705_v25 = vpop.f32.mrb[9].mxu0 }
 0x108   :  { %v536_v26 = vld [vmem:[#allocation2 + $0x8] sm:$0xff]  ;;  %v706_v27 = vadd.f32 %v705_v25, %v704_v21  ;;  %v745_v28 = vpop.f32.mrb[9].mxu1  ;;  %v707_v29 = vpop.f32.mrb[10].mxu0 }
 0x109   :  { %v559_v30 = vsel %vm543_vm1, %v535_v20, %v551_v22  ;;  %vm544_vm3 = vcmp.ge.f32.partialorder %v536_v26, 0.0  ;;  %v552_v31 = vmul.f32 0.2, %v536_v26  ;;  %527 = vst.msk [vmem:[#allocation2 + $0x18] sm:$0xff] %vm16_vm0, %v518_v23  ;;  %v746_v32 = vadd.f32 %v745_v28, %v744_v24  ;;  %v747_v33 = vpop.f32.mrb[10].mxu1  ;;  %v708_v34 = vpop.f32.mrb[11].mxu0 }
 0x10a   :  { %v668_v35 = vpack.c.bf16 %v559_v30, %v559_v30  ;;  %v709_v37 = vadd.f32 %v708_v34, %v707_v29  ;;  %v748_v38 = vpop.f32.mrb[11].mxu1 }
 0x10b   :  { %v560_v39 = vsel %vm544_vm3, %v536_v26, %v552_v31  ;;  %v501_v40 = vadd.f32 %v746_v32, %v706_v27  ;;  %v749_v41 = vadd.f32 %v748_v38, %v747_v33 }
 0x10c   :  { %600 = vst.msk [vmem:[%s1023_s2] sm:$0xf] %vm599_vm2, %v668_v35  ;;  %v669_v42 = vpack.c.bf16 %v560_v39, %v560_v39 }
 0x10d   :  { %v519_v44 = vadd.f32 %v501_v40, %v29_v36  ;;  %v504_v45 = vadd.f32 %v749_v41, %v709_v37 }
 0x10e   :  { %601 = vst.msk [vmem:[%s1023_s2 + $0x4] sm:$0xf] %vm599_vm2, %v669_v42  ;;  %v537_v46 = vld [vmem:[#allocation2 + $0x10] sm:$0xff]  ;;  %v710_v47 = vpop.f32.mrb[12].mxu0 }
 0x10f   :  { %vm545_vm4 = vcmp.ge.f32.partialorder %v537_v46, 0.0  ;;  %v553_v48 = vmul.f32 0.2, %v537_v46  ;;  %528 = vst.msk [vmem:[#allocation2 + $0x20] sm:$0xff] %vm16_vm0, %v519_v44  ;;  %v520_v49 = vadd.f32 %v504_v45, %v30_v43  ;;  %v750_v50 = vpop.f32.mrb[12].mxu1  ;;  %v711_v51 = vpop.f32.mrb[13].mxu0 }
 0x110   :  { %v538_v52 = vld [vmem:[#allocation2 + $0x18] sm:$0xff]  ;;  %v712_v53 = vadd.f32 %v711_v51, %v710_v47  ;;  %v751_v54 = vpop.f32.mrb[13].mxu1  ;;  %v713_v55 = vpop.f32.mrb[14].mxu0 }
 0x111   :  { %v561_v56 = vsel %vm545_vm4, %v537_v46, %v553_v48  ;;  %vm546_vm5 = vcmp.ge.f32.partialorder %v538_v52, 0.0  ;;  %v554_v57 = vmul.f32 0.2, %v538_v52  ;;  %529 = vst.msk [vmem:[#allocation2 + $0x28] sm:$0xff] %vm16_vm0, %v520_v49  ;;  %v752_v58 = vadd.f32 %v751_v54, %v750_v50  ;;  %v753_v59 = vpop.f32.mrb[14].mxu1  ;;  %v714_v60 = vpop.f32.mrb[15].mxu0 }
 0x112   :  { %v670_v61 = vpack.c.bf16 %v561_v56, %v561_v56  ;;  %v715_v63 = vadd.f32 %v714_v60, %v713_v55  ;;  %v754_v0 = vpop.f32.mrb[15].mxu1 }
 0x113   :  { %v562_v1 = vsel %vm546_vm5, %v538_v52, %v554_v57  ;;  %v509_v2 = vadd.f32 %v752_v58, %v712_v53  ;;  %v755_v3 = vadd.f32 %v754_v0, %v753_v59 }
 0x114   :  { %602 = vst.msk [vmem:[%s1023_s2 + $0x8] sm:$0xf] %vm599_vm2, %v670_v61  ;;  %v671_v4 = vpack.c.bf16 %v562_v1, %v562_v1 }
 0x115   :  { %v521_v6 = vadd.f32 %v509_v2, %v31_v62  ;;  %v512_v7 = vadd.f32 %v755_v3, %v715_v63 }
 0x116   :  { %603 = vst.msk [vmem:[%s1023_s2 + $0xc] sm:$0xf] %vm599_vm2, %v671_v4  ;;  %v539_v8 = vld [vmem:[#allocation2 + $0x20] sm:$0xff] }
 0x117   :  { %vm547_vm6 = vcmp.ge.f32.partialorder %v539_v8, 0.0  ;;  %v555_v9 = vmul.f32 0.2, %v539_v8  ;;  %530 = vst.msk [vmem:[#allocation2 + $0x30] sm:$0xff] %vm16_vm0, %v521_v6  ;;  %v522_v10 = vadd.f32 %v512_v7, %v32_v5 }
 0x118   :  { %v540_v11 = vld [vmem:[#allocation2 + $0x28] sm:$0xff] }
 0x119   :  { %v563_v12 = vsel %vm547_vm6, %v539_v8, %v555_v9  ;;  %vm548_vm7 = vcmp.ge.f32.partialorder %v540_v11, 0.0  ;;  %v556_v13 = vmul.f32 0.2, %v540_v11  ;;  %531 = vst.msk [vmem:[#allocation2 + $0x38] sm:$0xff] %vm16_vm0, %v522_v10 }
 0x11a   :  { %v672_v14 = vpack.c.bf16 %v563_v12, %v563_v12 }
 0x11b   :  { %v564_v15 = vsel %vm548_vm7, %v540_v11, %v556_v13 }
 0x11c   :  { %604 = vst.msk [vmem:[%s1023_s2 + $0x10] sm:$0xf] %vm599_vm2, %v672_v14  ;;  %v673_v16 = vpack.c.bf16 %v564_v15, %v564_v15 }
 0x11e   :  { %605 = vst.msk [vmem:[%s1023_s2 + $0x14] sm:$0xf] %vm599_vm2, %v673_v16  ;;  %v541_v17 = vld [vmem:[#allocation2 + $0x30] sm:$0xff] }
 0x11f   :  { %vm549_vm8 = vcmp.ge.f32.partialorder %v541_v17, 0.0  ;;  %v557_v18 = vmul.f32 0.2, %v541_v17 }
 0x120   :  { %v542_v19 = vld [vmem:[#allocation2 + $0x38] sm:$0xff] }
 0x121   :  { %v565_v20 = vsel %vm549_vm8, %v541_v17, %v557_v18  ;;  %vm550_vm9 = vcmp.ge.f32.partialorder %v542_v19, 0.0  ;;  %v558_v21 = vmul.f32 0.2, %v542_v19 }
 0x122   :  { %v674_v22 = vpack.c.bf16 %v565_v20, %v565_v20 }
 0x123   :  { %v566_v23 = vsel %vm550_vm9, %v542_v19, %v558_v21 }
 0x124   :  { %606 = vst.msk [vmem:[%s1023_s2 + $0x18] sm:$0xf] %vm599_vm2, %v674_v22  ;;  %v675_v24 = vpack.c.bf16 %v566_v23, %v566_v23 }
 0x126   :  { %607 = vst.msk [vmem:[%s1023_s2 + $0x1c] sm:$0xf] %vm599_vm2, %v675_v24 }

// kernel: dcgan_d_nobn_forward.9
= control target key start
LH: loop header
LB: loop body
LE: loop exit
PB: predicated region body
PF: predicated region fallthrough
CT: control target
= control target key end

     0   :  { %7 = vsyncpa [#allocation4], 0  ;;  %s1499_s9 = smov 0   ;;  %s1501_s10 = smov 0   ;;  %s1659_s0 = inlined_call_operand.vmem [shape: bf16[1,2304], index: 0, kind: input, shape index: {}]   ;;  %s1660_s1 = inlined_call_operand.vmem [shape: bf16[2304,2], index: 1, kind: input, shape index: {}]   ;;  %s1661_s2 = inlined_call_operand.hbm [shape: f32[1,1], index: 2, kind: output, shape index: {}]  }
   0x1   :  { %s1503_s11 = smov 0  }
   0x2 LB: > { %s1116_s12 = sadd.s32 4294967295, %s1477_s11   ;;  %s22_s13 = sadd.s32 1, %s1473_s10  ;;  %s1477_s11 = sphi %s1503_s11, %s13_s11   ;;  %s1473_s10 = sphi %s1501_s10, %s1664_s10   ;;  %s1469_s9 = sphi %s1499_s9, %s1663_s9  }
   0x3   : > { %p23_p0 = scmp.ge.s32.totalorder %s22_s13, 2  ;;  %p1119_p1 = scmp.ge.s32.totalorder %s1477_s11, 1 }
   0x4   : > { %p136_p2 = scmp.lt.s32.totalorder %s1477_s11, 3 }
   0x5   : > { %s1666_s13 = smov (%p23_p0, %s22_s13), 0 }
   0x6   : > { %p137_p3 = pnand %p1119_p1, %p136_p2 }
   0x7   : > { %s160_s14 = smul.u32 (!%p137_p3), 9, %s1469_s9  ;;  %p1121_p6 = scmp.ne.s32.totalorder (!%p137_p3), %s1469_s9, 0 }
   0x8   : > { %140 = sbr.rel (%p137_p3) target bundleno = 517 (0x205), region = 28 }
   0x9   : > { %s165_s15 = smul.u32 (!%p137_p3), 144, %s1469_s9  ;;  %p161_p4 = scmp.lt.s32.totalorder (!%p137_p3), %s160_s14, 17 }
   0xb   : > { %p166_p5 = scmp.lt.s32.totalorder (!%p137_p3), %s165_s15, 287 }
   0xf   : > { %s1668_s14 = smov (!%p161_p4, %s160_s14), 17  ;;  %s1670_s15 = smov (!%p166_p5, %s165_s15), 287 }
  0x10   : > { %s1525_s18 = scalar_lea.vmem %s1659_s0, %s1668_s14  ;;  %s1120_s19 = sshll.u32 %s1670_s15, 2  ;;  %vm179_vm0 = vcmask (!%p1121_p6), 8192   ;;  %v1479_v0 = vmov (!%p1121_p6), 0.0  }
  0x11   : > { %s1530_s22 = scalar_lea.vmem %s1660_s1, %s1120_s19  ;;  %178 = sbr.rel (%p1121_p6) target bundleno = 24 (0x18), region = 32  ;;  %180 = vst.msk [vmem:[#allocation2] sm:$0x1] (!%p1121_p6), %vm179_vm0, %v1479_v0 }
  0x18 PF: > { %v1352_v1 = vld [vmem:[%s1530_s22 + $0x40] sm:$0xff]   ;;  %v1356_v5 = vld [vmem:[%s1530_s22 + $0x48] sm:$0xff]   ;;  %v1360_v9 = vld [vmem:[%s1530_s22 + $0x50] sm:$0xff]   ;;  %v334_v30 = vlaneseq  ;;  %v1480_v36 = vmov 1966171168   ;;  %vm1482_vm1 = vmmov 0  }
  0x19   : > { %v1353_v2 = vld [vmem:[%s1530_s22 + $0xc0] sm:$0xff]   ;;  %1200 = vmatprep.subr.bf16.mxu0 %v1352_v1  ;;  %v1357_v6 = vld [vmem:[%s1530_s22 + $0xc8] sm:$0xff]   ;;  %v1361_v10 = vld [vmem:[%s1530_s22 + $0xd0] sm:$0xff]   ;;  %v332_v37 = vunpack.c.l.s4 %v1480_v36  ;;  %vm1035_vm2 = vcmask 8192   ;;  %p1195_p7 = scmp.ne.s32.totalorder %s1469_s9, 1 }
  0x1a   : > { %v1354_v3 = vld [vmem:[%s1530_s22] sm:$0xff]   ;;  %1222 = vmatprep.subr.bf16.mxu1 %v1353_v2  ;;  %v1358_v7 = vld [vmem:[%s1530_s22 + $0x8] sm:$0xff]   ;;  %v1362_v11 = vld [vmem:[%s1530_s22 + $0x10] sm:$0xff]   ;;  %v335_v34 = vshrl.u32 %v334_v30, 7  ;;  %vm1047_vm3 = vcmask (!%p1195_p7), 0  }
  0x1b   : > { %v1355_v4 = vld [vmem:[%s1530_s22 + $0x80] sm:$0xff]   ;;  %1201 = vmatpush3.bf16.msra.mxu0 %v1354_v3  ;;  %v1359_v8 = vld [vmem:[%s1530_s22 + $0x88] sm:$0xff]   ;;  %v1363_v12 = vld [vmem:[%s1530_s22 + $0x90] sm:$0xff]   ;;  %v333_v40 = vunpack.c.0.s8 %v332_v37 }
  0x1c   : > { %1223 = vmatpush3.bf16.msra.mxu1 %v1355_v4  ;;  %1202 = vmatprep.subr.bf16.mxu0 %v1356_v5  ;;  %v1364_v13 = vld [vmem:[%s1530_s22 + $0x58] sm:$0xff]   ;;  %v1368_v17 = vld [vmem:[%s1530_s22 + $0x60] sm:$0xff]   ;;  %v1372_v21 = vld [vmem:[%s1530_s22 + $0x68] sm:$0xff]  }
  0x1d   : > { %1224 = vmatprep.subr.bf16.mxu1 %v1357_v6  ;;  %v1365_v14 = vld [vmem:[%s1530_s22 + $0xd8] sm:$0xff]   ;;  %v1369_v18 = vld [vmem:[%s1530_s22 + $0xe0] sm:$0xff]   ;;  %v1373_v22 = vld [vmem:[%s1530_s22 + $0xe8] sm:$0xff]   ;;  %v1568_v42 = vsub.s32 %v333_v40, %v335_v34 }
  0x1e   : > { %v1366_v15 = vld [vmem:[%s1530_s22 + $0x18] sm:$0xff]   ;;  %v1370_v19 = vld [vmem:[%s1530_s22 + $0x20] sm:$0xff]   ;;  %v1374_v23 = vld [vmem:[%s1530_s22 + $0x28] sm:$0xff]  }
  0x1f   : > { %1203 = vmatpush3.bf16.msra.mxu0 %v1358_v7  ;;  %v1367_v16 = vld [vmem:[%s1530_s22 + $0x98] sm:$0xff]   ;;  %v1371_v20 = vld [vmem:[%s1530_s22 + $0xa0] sm:$0xff]   ;;  %v1375_v24 = vld [vmem:[%s1530_s22 + $0xa8] sm:$0xff]  }
  0x20   : > { %1225 = vmatpush3.bf16.msra.mxu1 %v1359_v8  ;;  %1204 = vmatprep.subr.bf16.mxu0 %v1360_v9  ;;  %v1376_v25 = vld [vmem:[%s1530_s22 + $0x70] sm:$0xff]   ;;  %v1380_v29 = vld [vmem:[%s1530_s22 + $0x78] sm:$0xff]   ;;  %v1385_v35 = vld [vmem:[%s1530_s22 + $0x140] sm:$0xff]  }
  0x21   : > { %1226 = vmatprep.subr.bf16.mxu1 %v1361_v10  ;;  %v1377_v26 = vld [vmem:[%s1530_s22 + $0xf0] sm:$0xff]   ;;  %v1381_v31 = vld [vmem:[%s1530_s22 + $0xf8] sm:$0xff]   ;;  %v182_v38 = vld [vmem:[%s1525_s18] sm:$0xff] }
  0x22   : > { %v1378_v27 = vld [vmem:[%s1530_s22 + $0x30] sm:$0xff]   ;;  %v1382_v32 = vld [vmem:[%s1530_s22 + $0x38] sm:$0xff]   ;;  %v330_v39 = vcombine.high %v182_v38, %v182_v38  ;;  %v1387_v41 = vld [vmem:[%s1530_s22 + $0x1c0] sm:$0xff]   ;;  %v337_v43 = vrot.slane %v182_v38, %v1568_v42 }
  0x23   : > { %1205 = vmatpush3.bf16.msra.mxu0 %v1362_v11  ;;  %v1379_v28 = vld [vmem:[%s1530_s22 + $0xb0] sm:$0xff]   ;;  %v1383_v33 = vld [vmem:[%s1530_s22 + $0xb8] sm:$0xff]   ;;  %v1386_v49 = vld [vmem:[%s1530_s22 + $0x100] sm:$0xff]  }
  0x24   : > { %1227 = vmatpush3.bf16.msra.mxu1 %v1363_v12  ;;  %1206 = vmatprep.subr.bf16.mxu0 %v1364_v13  ;;  %v1572_v44 = vrot.slane %v330_v39, %v1568_v42  ;;  %v345_v45 = vcombine.high %v337_v43, %v337_v43  ;;  %v353_v46 = vrot.slane %v337_v43, %v1568_v42  ;;  %v1389_v52 = vld [vmem:[%s1530_s22 + $0x148] sm:$0xff]   ;;  %v1388_v54 = vld [vmem:[%s1530_s22 + $0x180] sm:$0xff]   ;;  %v1393_v58 = vld [vmem:[%s1530_s22 + $0x150] sm:$0xff]  }
  0x25   : > { %1228 = vmatprep.subr.bf16.mxu1 %v1365_v14  ;;  %v1391_v55 = vld [vmem:[%s1530_s22 + $0x1c8] sm:$0xff]   ;;  %v1395_v60 = vld [vmem:[%s1530_s22 + $0x1d0] sm:$0xff]   ;;  %v1397_v62 = vld [vmem:[%s1530_s22 + $0x158] sm:$0xff]  }
  0x26   : > { %v346_v47 = vcombine.high %v1572_v44, %v1572_v44  ;;  %v367_v48 = vrot.slane %v345_v45, %v1568_v42  ;;  %v375_v51 = vcombine.high %v353_v46, %v353_v46  ;;  %v1390_v57 = vld [vmem:[%s1530_s22 + $0x108] sm:$0xff]   ;;  %v1394_v61 = vld [vmem:[%s1530_s22 + $0x110] sm:$0xff]   ;;  %v1399_v0 = vld [vmem:[%s1530_s22 + $0x1d8] sm:$0xff]  }
  0x27   : > { %1207 = vmatpush3.bf16.msra.mxu0 %v1366_v15  ;;  %v1392_v59 = vld [vmem:[%s1530_s22 + $0x188] sm:$0xff]   ;;  %v1396_v63 = vld [vmem:[%s1530_s22 + $0x190] sm:$0xff]   ;;  %v1398_v1 = vld [vmem:[%s1530_s22 + $0x118] sm:$0xff]  }
  0x28   : > { %1229 = vmatpush3.bf16.msra.mxu1 %v1367_v16  ;;  %1208 = vmatprep.subr.bf16.mxu0 %v1368_v17  ;;  %v374_v50 = vrot.slane %v346_v47, %v1568_v42  ;;  %v377_v53 = vcombine.high %v367_v48, %v367_v48  ;;  %v1401_v2 = vld [vmem:[%s1530_s22 + $0x160] sm:$0xff]   ;;  %v1400_v3 = vld [vmem:[%s1530_s22 + $0x198] sm:$0xff]   ;;  %v1405_v6 = vld [vmem:[%s1530_s22 + $0x168] sm:$0xff]  }
  0x29   : > { %1230 = vmatprep.subr.bf16.mxu1 %v1369_v18  ;;  %866 = vmatprep.mubr.bf16.mxu0 %v367_v48  ;;  %v1403_v4 = vld [vmem:[%s1530_s22 + $0x1e0] sm:$0xff]   ;;  %v1407_v8 = vld [vmem:[%s1530_s22 + $0x1e8] sm:$0xff]   ;;  %v1409_v10 = vld [vmem:[%s1530_s22 + $0x170] sm:$0xff]   ;;  %v360_v18 = vrot.slane %v1572_v44, %v1568_v42 }
  0x2a   : > { %v378_v56 = vcombine.high %v374_v50, %v374_v50  ;;  %906 = vmatprep.mubr.bf16.mxu1 %v377_v53  ;;  %v1402_v5 = vld [vmem:[%s1530_s22 + $0x120] sm:$0xff]   ;;  %v1406_v9 = vld [vmem:[%s1530_s22 + $0x128] sm:$0xff]   ;;  %v1411_v12 = vld [vmem:[%s1530_s22 + $0x1f0] sm:$0xff]  }
  0x2b   : > { %1209 = vmatpush3.bf16.msra.mxu0 %v1370_v19  ;;  %v1404_v7 = vld [vmem:[%s1530_s22 + $0x1a0] sm:$0xff]   ;;  %v1408_v11 = vld [vmem:[%s1530_s22 + $0x1a8] sm:$0xff]   ;;  %v1410_v13 = vld [vmem:[%s1530_s22 + $0x130] sm:$0xff]  }
  0x2c   : > { %1231 = vmatpush3.bf16.msra.mxu1 %v1371_v20  ;;  %1210 = vmatprep.subr.bf16.mxu0 %v1372_v21  ;;  %v1413_v14 = vld [vmem:[%s1530_s22 + $0x178] sm:$0xff]   ;;  %v1412_v15 = vld [vmem:[%s1530_s22 + $0x1b0] sm:$0xff]   ;;  %v1417_v20 = vld [vmem:[%s1530_s22 + $0x200] sm:$0xff]   ;;  %v1481_v21 = vmov 0.0  }
  0x2d   : > { %1232 = vmatprep.subr.bf16.mxu1 %v1373_v22  ;;  %v1415_v16 = vld [vmem:[%s1530_s22 + $0x1f8] sm:$0xff]   ;;  %v376_v22 = vcombine.high %v360_v18, %v360_v18  ;;  %v1122_v30 = vld.sshfl [vmem:[%s1525_s18 + $0x8] sm:$0x1 pattern:$0x75316420] }
  0x2e   : > { %v1414_v17 = vld [vmem:[%s1530_s22 + $0x138] sm:$0xff]  }
  0x2f   : > { %1211 = vmatpush3.bf16.msra.mxu0 %v1374_v23  ;;  %v1416_v19 = vld [vmem:[%s1530_s22 + $0x1b8] sm:$0xff]   ;;  %v1418_v23 = vld [vmem:[%s1530_s22 + $0x208] sm:$0xff]  }
  0x30   : > { %1233 = vmatpush3.bf16.msra.mxu1 %v1375_v24  ;;  %1212 = vmatprep.subr.bf16.mxu0 %v1376_v25  ;;  %v1419_v24 = vld [vmem:[%s1530_s22 + $0x210] sm:$0xff]   ;;  %v1420_v25 = vld [vmem:[%s1530_s22 + $0x218] sm:$0xff]  }
  0x31   : > { %1234 = vmatprep.subr.bf16.mxu1 %v1377_v26  ;;  %v1421_v26 = vld [vmem:[%s1530_s22 + $0x220] sm:$0xff]  }
  0x33   : > { %1213 = vmatpush3.bf16.msra.mxu0 %v1378_v27  ;;  %v1422_v27 = vld [vmem:[%s1530_s22 + $0x228] sm:$0xff]  }
  0x34   : > { %1235 = vmatpush3.bf16.msra.mxu1 %v1379_v28  ;;  %1214 = vmatprep.subr.bf16.mxu0 %v1380_v29  ;;  %v1423_v28 = vld [vmem:[%s1530_s22 + $0x230] sm:$0xff]   ;;  %v1424_v29 = vld [vmem:[%s1530_s22 + $0x238] sm:$0xff]  }
  0x35   : > { %1236 = vmatprep.subr.bf16.mxu1 %v1381_v31  ;;  %v392_v31 = vrot.slane %v1122_v30, %v1568_v42 }
  0x37   : > { %1215 = vmatpush3.bf16.msra.mxu0 %v1382_v32 }
  0x38   : > { %1237 = vmatpush3.bf16.msra.mxu1 %v1383_v33  ;;  %1244 = vmatprep.subr.bf16.mxu0 %v1385_v35 }
  0x39   : > { %1266 = vmatprep.subr.bf16.mxu1 %v1387_v41 }
  0x3a   : > { %867 = vmatmul.mubr.bf16.vlgmr.msra.gmra.mrb[0].mxu0 %v353_v46 }
  0x3b   : > { %1245 = vmatpush3.bf16.msra.mxu0 %v1386_v49  ;;  %907 = vmatmul.mubr.bf16.vlgmr.msra.gmra.mrb[0].mxu1 %v375_v51 }
  0x3c   : > { %1246 = vmatprep.subr.bf16.mxu0 %v1389_v52  ;;  %1267 = vmatpush3.bf16.msra.mxu1 %v1388_v54 }
  0x3d   : > { %946 = vmatprep.mubr.bf16.mxu0 %v374_v50  ;;  %1268 = vmatprep.subr.bf16.mxu1 %v1391_v55  ;;  %v181_v55 = vld [vmem:[#allocation2] sm:$0x1] }
  0x3e   : > { %986 = vmatprep.mubr.bf16.mxu1 %v378_v56 }
  0x3f   : > { %1247 = vmatpush3.bf16.msra.mxu0 %v1390_v57 }
  0x40   : > { %1248 = vmatprep.subr.bf16.mxu0 %v1393_v58  ;;  %1269 = vmatpush3.bf16.msra.mxu1 %v1392_v59 }
  0x41   : > { %1270 = vmatprep.subr.bf16.mxu1 %v1395_v60 }
  0x43   : > { %1249 = vmatpush3.bf16.msra.mxu0 %v1394_v61 }
  0x44   : > { %1250 = vmatprep.subr.bf16.mxu0 %v1397_v62  ;;  %1271 = vmatpush3.bf16.msra.mxu1 %v1396_v63 }
  0x45   : > { %1272 = vmatprep.subr.bf16.mxu1 %v1399_v0 }
  0x47   : > { %1251 = vmatpush3.bf16.msra.mxu0 %v1398_v1 }
  0x48   : > { %1252 = vmatprep.subr.bf16.mxu0 %v1401_v2  ;;  %1273 = vmatpush3.bf16.msra.mxu1 %v1400_v3 }
  0x49   : > { %1274 = vmatprep.subr.bf16.mxu1 %v1403_v4 }
  0x4b   : > { %1253 = vmatpush3.bf16.msra.mxu0 %v1402_v5 }
  0x4c   : > { %1254 = vmatprep.subr.bf16.mxu0 %v1405_v6  ;;  %1275 = vmatpush3.bf16.msra.mxu1 %v1404_v7 }
  0x4d   : > { %1276 = vmatprep.subr.bf16.mxu1 %v1407_v8 }
  0x4f   : > { %1255 = vmatpush3.bf16.msra.mxu0 %v1406_v9 }
  0x50   : > { %1256 = vmatprep.subr.bf16.mxu0 %v1409_v10  ;;  %1277 = vmatpush3.bf16.msra.mxu1 %v1408_v11 }
  0x51   : > { %1278 = vmatprep.subr.bf16.mxu1 %v1411_v12 }
  0x53   : > { %1257 = vmatpush3.bf16.msra.mxu0 %v1410_v13 }
  0x54   : > { %1258 = vmatprep.subr.bf16.mxu0 %v1413_v14  ;;  %1279 = vmatpush3.bf16.msra.mxu1 %v1412_v15 }
  0x55   : > { %1280 = vmatprep.subr.bf16.mxu1 %v1415_v16 }
  0x57   : > { %1259 = vmatpush3.bf16.msra.mxu0 %v1414_v17 }
  0x58   : > { %1297 = vmatprep.subr.bf16.mxu0 %v1481_v21  ;;  %1281 = vmatpush3.bf16.msra.mxu1 %v1416_v19 }
  0x5a   : > { %947 = vmatmul.mubr.bf16.vlgmr.msra.gmra.mrb[4].mxu0 %v360_v18 }
  0x5b   : > { %1298 = vmatpush3.bf16.msra.mxu0 %v1417_v20  ;;  %1313 = vmatprep.mubr.msk.bf16.mxu0 %vm1482_vm1, %v1481_v21 }
  0x5c   : > { %987 = vmatmul.mubr.bf16.vlgmr.msra.gmra.mrb[4].mxu1 %v376_v22  ;;  %1299 = vmatprep.subr.bf16.mxu0 %v1481_v21 }
  0x5f   : > { %1300 = vmatpush3.bf16.msra.mxu0 %v1418_v23 }
  0x60   : > { %1301 = vmatprep.subr.bf16.mxu0 %v1481_v21 }
  0x63   : > { %1302 = vmatpush3.bf16.msra.mxu0 %v1419_v24 }
  0x64   : > { %1303 = vmatprep.subr.bf16.mxu0 %v1481_v21 }
  0x67   : > { %1304 = vmatpush3.bf16.msra.mxu0 %v1420_v25 }
  0x68   : > { %1305 = vmatprep.subr.bf16.mxu0 %v1481_v21 }
  0x6b   : > { %1306 = vmatpush3.bf16.msra.mxu0 %v1421_v26 }
  0x6c   : > { %1307 = vmatprep.subr.bf16.mxu0 %v1481_v21 }
  0x6f   : > { %1308 = vmatpush3.bf16.msra.mxu0 %v1422_v27 }
  0x70   : > { %1309 = vmatprep.subr.bf16.mxu0 %v1481_v21 }
  0x73   : > { %1310 = vmatpush3.bf16.msra.mxu0 %v1423_v28 }
  0x74   : > { %1311 = vmatprep.subr.bf16.mxu0 %v1481_v21 }
  0x77   : > { %1312 = vmatpush3.bf16.msra.mxu0 %v1424_v29 }
  0x7a   : > { %1314 = vmatmul.mubr.bf16.vlgmr.msra.gmra.mrb[8].mxu0 %v392_v31 }
 0x10d   : > { %v1216_v32 = vpop.f32.mrb[0].mxu0 }
 0x10e   : > { %v1217_v33 = vpop.f32.mrb[1].mxu0  ;;  %v1238_v34 = vpop.f32.mrb[0].mxu1 }
 0x10f   : > { %v1218_v35 = vadd.f32 %v1217_v33, %v1216_v32  ;;  %v1219_v36 = vpop.f32.mrb[2].mxu0  ;;  %v1239_v37 = vpop.f32.mrb[1].mxu1 }
 0x110   : > { %v1220_v38 = vpop.f32.mrb[3].mxu0  ;;  %v1240_v39 = vadd.f32 %v1239_v37, %v1238_v34  ;;  %v1241_v40 = vpop.f32.mrb[2].mxu1 }
 0x111   : > { %v1242_v41 = vpop.f32.mrb[3].mxu1 }
 0x112   : > { %v909_v43 = vadd.f32 %v1240_v39, %v1218_v35 }
 0x12d   : > { %v1260_v44 = vpop.f32.mrb[4].mxu0 }
 0x12e   : > { %v1261_v45 = vpop.f32.mrb[5].mxu0 }
 0x12f   : > { %v1262_v46 = vadd.f32 %v1261_v45, %v1260_v44  ;;  %v1263_v47 = vpop.f32.mrb[6].mxu0  ;;  %v1282_v48 = vpop.f32.mrb[4].mxu1 }
 0x130   : > { %v1264_v49 = vpop.f32.mrb[7].mxu0  ;;  %v1283_v42 = vpop.f32.mrb[5].mxu1 }
 0x131   : > { %v949_v50 = vadd.f32 %v1262_v46, %v909_v43  ;;  %v1284_v51 = vadd.f32 %v1283_v42, %v1282_v48  ;;  %v1285_v52 = vpop.f32.mrb[6].mxu1 }
 0x132   : > { %v1286_v53 = vpop.f32.mrb[7].mxu1 }
 0x133   : > { %v989_v54 = vadd.f32 %v1284_v51, %v949_v50 }
 0x14c   : > { %1040 = sbr.rel (%p1195_p7) target bundleno = 492 (0x1ec), region = 36 }
 0x14d   : > { %v1028_v56 = vpop.f32.mrb[8].mxu0 }
 0x14e   : > { %v1029_v57 = vadd.f32 %v1028_v56, %v989_v54  ;;  %v1315_v58 = vpop.f32.mrb[9].mxu0 }
 0x14f   : > { %v1031_v59 = vpop.f32.mrb[10].mxu0 }
 0x150   : > { %v1034_v60 = vadd.f32 %v1029_v57, %v181_v55  ;;  %v1316_v61 = vpop.f32.mrb[11].mxu0 }
 0x152   : > { %1036 = vst.msk [vmem:[#allocation2] sm:$0x1] %vm1035_vm2, %v1034_v60 }
 0x159   : > { %v1041_v62 = vld [vmem:[#allocation2] sm:$0x1] }
 0x15a   : > { %v1042_v63 = vsel %vm1035_vm2, %v1041_v62, 0.0 }
 0x15b   : > { %1043 = vadd.xlane.f32.xlu0 %v1042_v63 }
 0x1e8   : > { %v1044_v0 = vpop.xlane.xlu0 %1043 }
 0x1e9   : > { %v1046_v1 = vmul.f32 0.5, %v1044_v0 }
 0x1eb   : > { %1048 = vst.msk [vmem:[#allocation3] sm:$0x1] %vm1047_vm3, %v1046_v1 }
 0x1ec PF: > { %p1624_p8 = scmp.eq.s32.totalorder %s1116_s12, 1  ;;  %s1483_s24 = smov [#allocation3]  }
 0x1ed   : > { %s1056_s25 = sshll.u32 %s1483_s24, 4  ;;  %s1057_s25 = int_to_ptr.vmem [resolvable:$true] %s1056_s25 }
 0x1ee   : > { %s1425_s26 = scalar_lea.vmem %s1057_s25, 16  ;;  %s1431_s27 = scalar_lea.vmem %s1057_s25, 32 }
 0x1ef   : > { %p1426_p9 = scmp.ne.s32.totalorder %s1057_s25, %s1425_s26  ;;  %p1432_p12 = scmp.lt.s32.totalorder %s1057_s25, %s1057_s25 }
 0x1f0   : > { %p1433_p13 = scmp.lt.s32.totalorder %s1431_s27, %s1425_s26 }
 0x1f1   : > { %p1427_p10 = pnand %p1426_p9, %p1624_p8 }
 0x1f2   : > { %p1434_p0 = por %p1433_p13, %p1432_p12 }
 0x1f3   : > { %p1428_p11 = pneg %p1427_p10 }
 0x1f5   : > { %p1435_p1 = pnand %p1434_p0, %p1428_p11 }
 0x1f7   : > { %1438 = shalt.err (!%p1435_p1)
}
 0x1f8   : > { %s1439_s30 = scalar_lea.hbm %s1661_s2, 16 }
 0x1f9   : > { %p1440_p2 = scmp.ne.s32.totalorder %s1661_s2, %s1439_s30  ;;  %p1445_p5 = scmp.lt.u32.totalorder %s1439_s30, %s1661_s2 }
 0x1fb   : > { %p1441_p3 = pnand %p1440_p2, %p1624_p8 }
 0x1fd   : > { %p1442_p4 = pneg %p1441_p3 }
 0x1ff   : > { %p1447_p6 = pnand %p1445_p5, %p1442_p4 }
 0x201   : > { %1450 = shalt.err (!%p1447_p6)
}
 0x202   : > { %1318 = dma.vmem_to_hbm [thread:$0]  (%p1624_p8), %s1057_s25, 16, %s1661_s2, [#allocation4]  }
 0x203   : > { %1464 = dma.done.wait (%p1624_p8), [#allocation4], 16  }
 0x204   : > { %1466 = vsyncadd (%p1624_p8), [#allocation4], 4294967280 }
 0x205 PF: > { %s13_s11 = sadd.s32 1, %s1477_s11   ;;  %s1663_s9 = smov %s1473_s10 }
 0x206   : > { %p10_p7 = scmp.ge.s32.totalorder %s13_s11, 4   ;;  %s1664_s10 = smov %s1666_s13 }
 0x208   :  { %12 = sbr.rel (!%p10_p7) target bundleno = 2 (0x2), region = 66 }
 0x20f   :  { %1069 = vsyncpa [#allocation4], 1 }
 0x210   :  { %1071 = vsyncpa [#allocation4 + $0x1], 1 }

</bundles_post_ra>
